<compile_context>
chip_gen: v6e
topology: v6e:2x2x1
jax: 0.10.0
libtpu: 0.0.40
codegen_flags: <defaults>
</compile_context>

<pallas_src>
import jax
import jax.numpy as jnp
from jax.experimental import pallas as pl
from jax.experimental.pallas import tpu as pltpu


NODES_PER_GRAPH = 10          # fixed by fc1 = Linear(8 * 10, 16)
HID = 8                       # conv hidden width
LANES = 128                   # TPU lane width; fc2 out padded to this
MAX_TILE_GRAPHS = 128         # graphs per grid step (multiple of 8; ~10 MB padded VMEM)

# packed-parameter slab layout ([112, 128] f32, section starts 8-row aligned)
_ROW_W1 = 0       # [1, 8]   conv1 weight (in_feats == 1)
_ROW_B1 = 1       # [1, 8]   conv1 bias
_ROW_B2 = 2       # [1, 8]   conv2 bias
_ROW_BF1 = 3      # [1, 16]  fc1 bias
_ROW_BF2 = 4      # [1, 128] fc2 bias (cols >= 3 are zero)
_ROW_W2 = 8       # [8, 8]   conv2 weight
_ROW_WF1 = 16     # [80, 16] fc1 weight
_ROW_WF2 = 96     # [16, 128] fc2 weight (cols >= 3 are zero)
_P_ROWS = 112


# ----------------------------- Pallas kernel -------------------------------

def gcn_fused_kernel(a_ref, x_ref, p_ref, o_ref):
    """Whole GCN forward for one tile of TB graphs.

    a_ref: [TB, 10, 10] per-graph normalized adjacency (block-diagonal form)
    x_ref: [TB, 10, 1]  node features
    p_ref: [112, 128]   packed parameters (see layout above)
    o_ref: [TB, 128]    lane-padded logits (cols 0:3 are the real output)
    """
    a = a_ref[...]                                    # [TB, 10, 10]
    x = x_ref[...]                                    # [TB, 10, 1]
    tb, npg, _ = a.shape

    # parameters (static slices of the packed slab; tiny, once per grid step)
    w1 = p_ref[_ROW_W1:_ROW_W1 + 1, 0:HID]            # [1, 8]
    b1 = p_ref[_ROW_B1:_ROW_B1 + 1, 0:HID]            # [1, 8]
    b2 = p_ref[_ROW_B2:_ROW_B2 + 1, 0:HID]            # [1, 8]
    bf1 = p_ref[_ROW_BF1:_ROW_BF1 + 1, 0:16]          # [1, 16]
    bf2 = p_ref[_ROW_BF2:_ROW_BF2 + 1, :]             # [1, 128] (padded)
    w2 = p_ref[_ROW_W2:_ROW_W2 + HID, 0:HID]          # [8, 8]
    wf1 = p_ref[_ROW_WF1:_ROW_WF1 + 80, 0:16]         # [80, 16]
    wf2 = p_ref[_ROW_WF2:_ROW_WF2 + 16, :]            # [16, 128] (padded)

    def aggregate(t):
        # A_hat @ t per graph, as npg unrolled VPU broadcast-FMAs (no MXU):
        # out[b,i,f] = sum_j a[b,i,j] * t[b,j,f]
        acc = a[:, :, 0:1] * t[:, 0:1, :]
        for j in range(1, npg):
            acc = acc + a[:, :, j:j + 1] * t[:, j:j + 1, :]
        return acc

    # --- conv1: in_feats == 1 -> aggregate first (f=1), then scale by w1 ----
    agg1 = aggregate(x)                                       # [TB, 10, 1]
    h = jnp.maximum(agg1 * w1[None] + b1[None], 0.0)          # [TB, 10, 8]

    # --- conv2: feature transform as 8 VPU FMAs (shared [8,8] weight), ------
    # --- then aggregate, bias, relu ------------------------------------------
    t = h[:, :, 0:1] * w2[0:1, :][None]
    for f in range(1, HID):
        t = t + h[:, :, f:f + 1] * w2[f:f + 1, :][None]       # [TB, 10, 8]
    h = jnp.maximum(aggregate(t) + b2[None], 0.0)             # [TB, 10, 8]

    # --- fc1 with the torch view(-1, 80) flatten folded in -------------------
    # flat[b, 8n + f] = h[b, n, f]  =>  flat @ Wfc1 == sum_n h[:, n, :] @ Wfc1[8n:8n+8]
    # (kept as per-node partial dots; see header note on Mosaic reshape limits)
    z = jnp.dot(h[:, 0, :], wf1[0:HID, :], preferred_element_type=jnp.float32)
    for n in range(1, npg):
        z = z + jnp.dot(h[:, n, :], wf1[HID * n:HID * (n + 1), :],
                        preferred_element_type=jnp.float32)
    z = jnp.maximum(z + bf1, 0.0)                             # [TB, 16]

    # --- fc2 (lane-padded so the store is an unmasked [TB, 128] slab) --------
    o_ref[...] = jnp.dot(z, wf2, preferred_element_type=jnp.float32) + bf2


# ------------------------------- wrappers ----------------------------------

def run_gcn_fused(a_blocks, x_blocks, packed, tile_b):
    b_pad, npg, _ = a_blocks.shape
    n_tiles = b_pad // tile_b
    return pl.pallas_call(
        gcn_fused_kernel,
        grid=(n_tiles,),
        in_specs=[
            pl.BlockSpec((tile_b, npg, npg), lambda i: (i, 0, 0)),
            pl.BlockSpec((tile_b, npg, 1), lambda i: (i, 0, 0)),
            pl.BlockSpec((_P_ROWS, LANES), lambda i: (0, 0)),   # fetched once
        ],
        out_specs=pl.BlockSpec((tile_b, LANES), lambda i: (i, 0)),
        out_shape=jax.ShapeDtypeStruct((b_pad, LANES), jnp.float32),
        compiler_params=pltpu.CompilerParams(
            # batch-tile axis is independent; with >=2 tiles v7x's second
            # TensorCore can take half of them (no-op when n_tiles == 1).
            dimension_semantics=("parallel",)),
    )(a_blocks, x_blocks, packed)


def pack_params(params):
    """Pack all small weights/biases into one [112, 128] f32 slab (one DMA)."""
    p = jnp.zeros((_P_ROWS, LANES), jnp.float32)
    p = p.at[_ROW_W1, 0:8].set(params["w_conv1"].reshape(8))
    p = p.at[_ROW_B1, 0:8].set(params["b_conv1"].reshape(8))
    p = p.at[_ROW_B2, 0:8].set(params["b_conv2"].reshape(8))
    p = p.at[_ROW_BF1, 0:16].set(params["b_fc1"].reshape(16))
    p = p.at[_ROW_BF2, 0:3].set(params["b_fc2"].reshape(3))
    p = p.at[_ROW_W2:_ROW_W2 + 8, 0:8].set(params["w_conv2"])
    p = p.at[_ROW_WF1:_ROW_WF1 + 80, 0:16].set(params["w_fc1"])
    p = p.at[_ROW_WF2:_ROW_WF2 + 16, 0:3].set(params["w_fc2"])
    return p


def build_norm_adj_blocks(edge_index, edge_weight, num_graphs, nodes_per_graph):
    """GCNConv normalization per graph: A_b = D^{-1/2} (A_w + I) D^{-1/2},
    self-loop weight 1, returned block-diagonal as [B, npg, npg].
    # TODO(synk): edge-list scatter-add has no clean Pallas equivalent; plain JAX glue."""
    src, dst = edge_index[0], edge_index[1]
    g = dst // nodes_per_graph                        # graph id of each edge
    # guard against silently mis-binned cross-graph edges (concrete inputs only)
    try:
        ok = bool(jnp.all(src // nodes_per_graph == g))
    except Exception:                                 # tracing: skip the check
        ok = True
    assert ok, "cross-graph edge found; graphs must be fixed-size and graph-major"
    ls = src - g * nodes_per_graph
    ld = dst - g * nodes_per_graph
    a = jnp.zeros((num_graphs, nodes_per_graph, nodes_per_graph), jnp.float32)
    a = a.at[g, ld, ls].add(edge_weight)              # message flows src -> dst
    a = a + jnp.eye(nodes_per_graph, dtype=jnp.float32)[None]
    deg = a.sum(axis=2)
    dinv = jnp.where(deg > 0, jax.lax.rsqrt(deg), 0.0)
    return dinv[:, :, None] * a * dinv[:, None, :]


def gcn_forward(x, edge_index, edge_attr, params, nodes_per_graph=NODES_PER_GRAPH):
    n = x.shape[0]
    assert n % nodes_per_graph == 0, "nodes must be graph-major with fixed-size graphs"
    b = n // nodes_per_graph
    a_blocks = build_norm_adj_blocks(edge_index, edge_attr, b, nodes_per_graph)
    x_blocks = x.reshape(b, nodes_per_graph, 1)
    packed = pack_params(params)                      # one-time host-side packing

    # batch tiling: one whole-array block for small B, else 128-graph tiles
    if b <= MAX_TILE_GRAPHS:
        tile_b, b_pad = b, b
    else:
        tile_b = MAX_TILE_GRAPHS
        b_pad = ((b + tile_b - 1) // tile_b) * tile_b
    if b_pad != b:
        pad = b_pad - b
        a_blocks = jnp.concatenate(
            [a_blocks, jnp.zeros((pad, nodes_per_graph, nodes_per_graph), jnp.float32)], axis=0)
        x_blocks = jnp.concatenate(
            [x_blocks, jnp.zeros((pad, nodes_per_graph, 1), jnp.float32)], axis=0)

    out_pad = run_gcn_fused(a_blocks, x_blocks, packed, tile_b)   # [B_pad, 128]
    return out_pad[:b, :3]                            # un-pad batch + lanes


# plain-JAX reference (dense A_hat), for numerical sanity only
def _reference_forward(x, edge_index, edge_attr, params, nodes_per_graph):
    hi = jax.lax.Precision.HIGHEST
    n = x.shape[0]
    src, dst = edge_index[0], edge_index[1]
    a = jnp.zeros((n, n), jnp.float32).at[dst, src].add(edge_attr)
    a = a + jnp.eye(n, dtype=jnp.float32)
    deg = a.sum(axis=1)
    dinv = jnp.where(deg > 0, jax.lax.rsqrt(deg), 0.0)
    a_hat = dinv[:, None] * a * dinv[None, :]
    h = jax.nn.relu(jnp.dot(a_hat, jnp.dot(x, params["w_conv1"], precision=hi),
                            precision=hi) + params["b_conv1"])
    h = jax.nn.relu(jnp.dot(a_hat, jnp.dot(h, params["w_conv2"], precision=hi),
                            precision=hi) + params["b_conv2"])
    flat = h.reshape(-1, 8 * nodes_per_graph)
    z = jax.nn.relu(jnp.dot(flat, params["w_fc1"], precision=hi) + params["b_fc1"])
    return jnp.dot(z, params["w_fc2"], precision=hi) + params["b_fc2"]


# --------------------------------- main -------------------------------------

if __name__ == "__main__":
    def make_inputs(key, num_graphs):
        ks = jax.random.split(key, 2)
        n = num_graphs * NODES_PER_GRAPH
        xs = jax.random.normal(ks[0], (n, 1), jnp.float32)
        # ring graph inside each graph, bidirectional edges
        src, dst = [], []
        for g in range(num_graphs):
            for i in range(NODES_PER_GRAPH):
                u = g * NODES_PER_GRAPH + i
                v = g * NODES_PER_GRAPH + (i + 1) % NODES_PER_GRAPH
                src += [u, v]
                dst += [v, u]
        ei = jnp.array([src, dst], dtype=jnp.int32)                   # [2, E]
        ea = jax.random.uniform(ks[1], (ei.shape[1],), jnp.float32, 0.5, 1.5)
        return xs, ei, ea

    key = jax.random.PRNGKey(0)
    kp, k_small, k_large = jax.random.split(key, 3)
    ks = iter(jax.random.split(kp, 8))

    # deterministic synthetic parameters (shapes from module __init__, [in, out])
    params = {
        "w_conv1": 0.5 * jax.random.normal(next(ks), (1, 8), jnp.float32),
        "b_conv1": 0.1 * jax.random.normal(next(ks), (1, 8), jnp.float32),
        "w_conv2": 0.5 * jax.random.normal(next(ks), (8, 8), jnp.float32),
        "b_conv2": 0.1 * jax.random.normal(next(ks), (1, 8), jnp.float32),
        "w_fc1":   0.2 * jax.random.normal(next(ks), (80, 16), jnp.float32),
        "b_fc1":   0.1 * jax.random.normal(next(ks), (1, 16), jnp.float32),
        "w_fc2":   0.2 * jax.random.normal(next(ks), (16, 3), jnp.float32),
        "b_fc2":   0.1 * jax.random.normal(next(ks), (1, 3), jnp.float32),
    }

    # small case (B = 2 graphs of 10 nodes, matches the torch module's fc1)
    B = 2
    x, edge_index, edge_attr = make_inputs(k_small, B)
    out = gcn_forward(x, edge_index, edge_attr, params)
    jax.block_until_ready(out)
    assert out.shape == (B, 3) and out.dtype == jnp.float32
    ref = _reference_forward(x, edge_index, edge_attr, params, NODES_PER_GRAPH)
    assert jnp.allclose(out, ref, atol=2e-3, rtol=2e-3), "mismatch vs plain-JAX reference"

    # larger case exercising the batch-tiled / padded / multi-grid-step path
    BL = 144                                  # -> TB=128, padded to 256, grid=(2,)
    xl, eil, eal = make_inputs(k_large, BL)
    out_l = gcn_forward(xl, eil, eal, params)
    jax.block_until_ready(out_l)
    assert out_l.shape == (BL, 3) and out_l.dtype == jnp.float32
    ref_l = _reference_forward(xl, eil, eal, params, NODES_PER_GRAPH)
    assert jnp.allclose(out_l, ref_l, atol=2e-3, rtol=2e-3), "tiled-path mismatch"

    print("KERNEL_OK")
</pallas_src>

<mosaic_0001>
module attributes {stable_mosaic.version = 11 : i64} {
  func.func @gcn_fused_kernel(%arg0: i32, %arg1: memref<2x10x10xf32, #tpu.memory_space<vmem>>, %arg2: memref<2x10x1xf32, #tpu.memory_space<vmem>>, %arg3: memref<112x128xf32, #tpu.memory_space<vmem>>, %arg4: memref<2x128xf32, #tpu.memory_space<vmem>>) attributes {dimension_semantics = [#tpu.dimension_semantics<parallel>], iteration_bounds = array<i64: 1>, scalar_prefetch = 0 : i64, scratch_operands = 0 : i64, tpu.core_type = #tpu.core_type<tc>, window_params = [{transform_indices = @transform_0, window_bounds = array<i64: 2, 10, 10>}, {transform_indices = @transform_1, window_bounds = array<i64: 2, 10, 1>}, {pipeline_mode = #tpu.pipeline_mode<synchronous>, transform_indices = @transform_2, window_bounds = array<i64: 112, 128>}, {transform_indices = @transform_3, window_bounds = array<i64: 2, 128>}]} {
    %c0 = arith.constant 0 : index
    %c0_0 = arith.constant 0 : index
    %c0_1 = arith.constant 0 : index
    %0 = vector.load %arg1[%c0, %c0_0, %c0_1] : memref<2x10x10xf32, #tpu.memory_space<vmem>>, vector<2x10x10xf32>
    %c0_2 = arith.constant 0 : index
    %c0_3 = arith.constant 0 : index
    %c0_4 = arith.constant 0 : index
    %1 = vector.load %arg2[%c0_2, %c0_3, %c0_4] : memref<2x10x1xf32, #tpu.memory_space<vmem>>, vector<2x10x1xf32>
    %c0_5 = arith.constant 0 : index
    %c0_6 = arith.constant 0 : index
    %2 = vector.load %arg3[%c0_5, %c0_6] : memref<112x128xf32, #tpu.memory_space<vmem>>, vector<1x8xf32>
    %c1 = arith.constant 1 : index
    %c0_7 = arith.constant 0 : index
    %3 = vector.load %arg3[%c1, %c0_7] : memref<112x128xf32, #tpu.memory_space<vmem>>, vector<1x8xf32>
    %c2 = arith.constant 2 : index
    %c0_8 = arith.constant 0 : index
    %4 = vector.load %arg3[%c2, %c0_8] : memref<112x128xf32, #tpu.memory_space<vmem>>, vector<1x8xf32>
    %c3 = arith.constant 3 : index
    %c0_9 = arith.constant 0 : index
    %5 = vector.load %arg3[%c3, %c0_9] : memref<112x128xf32, #tpu.memory_space<vmem>>, vector<1x16xf32>
    %c4 = arith.constant 4 : index
    %c0_10 = arith.constant 0 : index
    %6 = vector.load %arg3[%c4, %c0_10] : memref<112x128xf32, #tpu.memory_space<vmem>>, vector<1x128xf32>
    %c8 = arith.constant 8 : index
    %c0_11 = arith.constant 0 : index
    %7 = vector.load %arg3[%c8, %c0_11] : memref<112x128xf32, #tpu.memory_space<vmem>>, vector<8x8xf32>
    %c16 = arith.constant 16 : index
    %c0_12 = arith.constant 0 : index
    %8 = vector.load %arg3[%c16, %c0_12] : memref<112x128xf32, #tpu.memory_space<vmem>>, vector<80x16xf32>
    %c96 = arith.constant 96 : index
    %c0_13 = arith.constant 0 : index
    %9 = vector.load %arg3[%c96, %c0_13] : memref<112x128xf32, #tpu.memory_space<vmem>>, vector<16x128xf32>
    %10 = vector.extract_strided_slice %0 {offsets = [0, 0, 0], sizes = [2, 10, 1], strides = [1, 1, 1]} : vector<2x10x10xf32> to vector<2x10x1xf32>
    %11 = vector.extract_strided_slice %1 {offsets = [0, 0, 0], sizes = [2, 1, 1], strides = [1, 1, 1]} : vector<2x10x1xf32> to vector<2x1x1xf32>
    %12 = vector.broadcast %11 : vector<2x1x1xf32> to vector<2x10x1xf32>
    %13 = arith.mulf %10, %12 : vector<2x10x1xf32>
    %14 = vector.extract_strided_slice %0 {offsets = [0, 0, 1], sizes = [2, 10, 1], strides = [1, 1, 1]} : vector<2x10x10xf32> to vector<2x10x1xf32>
    %15 = vector.extract_strided_slice %1 {offsets = [0, 1, 0], sizes = [2, 1, 1], strides = [1, 1, 1]} : vector<2x10x1xf32> to vector<2x1x1xf32>
    %16 = vector.broadcast %15 : vector<2x1x1xf32> to vector<2x10x1xf32>
    %17 = arith.mulf %14, %16 : vector<2x10x1xf32>
    %18 = arith.addf %13, %17 : vector<2x10x1xf32>
    %19 = vector.extract_strided_slice %0 {offsets = [0, 0, 2], sizes = [2, 10, 1], strides = [1, 1, 1]} : vector<2x10x10xf32> to vector<2x10x1xf32>
    %20 = vector.extract_strided_slice %1 {offsets = [0, 2, 0], sizes = [2, 1, 1], strides = [1, 1, 1]} : vector<2x10x1xf32> to vector<2x1x1xf32>
    %21 = vector.broadcast %20 : vector<2x1x1xf32> to vector<2x10x1xf32>
    %22 = arith.mulf %19, %21 : vector<2x10x1xf32>
    %23 = arith.addf %18, %22 : vector<2x10x1xf32>
    %24 = vector.extract_strided_slice %0 {offsets = [0, 0, 3], sizes = [2, 10, 1], strides = [1, 1, 1]} : vector<2x10x10xf32> to vector<2x10x1xf32>
    %25 = vector.extract_strided_slice %1 {offsets = [0, 3, 0], sizes = [2, 1, 1], strides = [1, 1, 1]} : vector<2x10x1xf32> to vector<2x1x1xf32>
    %26 = vector.broadcast %25 : vector<2x1x1xf32> to vector<2x10x1xf32>
    %27 = arith.mulf %24, %26 : vector<2x10x1xf32>
    %28 = arith.addf %23, %27 : vector<2x10x1xf32>
    %29 = vector.extract_strided_slice %0 {offsets = [0, 0, 4], sizes = [2, 10, 1], strides = [1, 1, 1]} : vector<2x10x10xf32> to vector<2x10x1xf32>
    %30 = vector.extract_strided_slice %1 {offsets = [0, 4, 0], sizes = [2, 1, 1], strides = [1, 1, 1]} : vector<2x10x1xf32> to vector<2x1x1xf32>
    %31 = vector.broadcast %30 : vector<2x1x1xf32> to vector<2x10x1xf32>
    %32 = arith.mulf %29, %31 : vector<2x10x1xf32>
    %33 = arith.addf %28, %32 : vector<2x10x1xf32>
    %34 = vector.extract_strided_slice %0 {offsets = [0, 0, 5], sizes = [2, 10, 1], strides = [1, 1, 1]} : vector<2x10x10xf32> to vector<2x10x1xf32>
    %35 = vector.extract_strided_slice %1 {offsets = [0, 5, 0], sizes = [2, 1, 1], strides = [1, 1, 1]} : vector<2x10x1xf32> to vector<2x1x1xf32>
    %36 = vector.broadcast %35 : vector<2x1x1xf32> to vector<2x10x1xf32>
    %37 = arith.mulf %34, %36 : vector<2x10x1xf32>
    %38 = arith.addf %33, %37 : vector<2x10x1xf32>
    %39 = vector.extract_strided_slice %0 {offsets = [0, 0, 6], sizes = [2, 10, 1], strides = [1, 1, 1]} : vector<2x10x10xf32> to vector<2x10x1xf32>
    %40 = vector.extract_strided_slice %1 {offsets = [0, 6, 0], sizes = [2, 1, 1], strides = [1, 1, 1]} : vector<2x10x1xf32> to vector<2x1x1xf32>
    %41 = vector.broadcast %40 : vector<2x1x1xf32> to vector<2x10x1xf32>
    %42 = arith.mulf %39, %41 : vector<2x10x1xf32>
    %43 = arith.addf %38, %42 : vector<2x10x1xf32>
    %44 = vector.extract_strided_slice %0 {offsets = [0, 0, 7], sizes = [2, 10, 1], strides = [1, 1, 1]} : vector<2x10x10xf32> to vector<2x10x1xf32>
    %45 = vector.extract_strided_slice %1 {offsets = [0, 7, 0], sizes = [2, 1, 1], strides = [1, 1, 1]} : vector<2x10x1xf32> to vector<2x1x1xf32>
    %46 = vector.broadcast %45 : vector<2x1x1xf32> to vector<2x10x1xf32>
    %47 = arith.mulf %44, %46 : vector<2x10x1xf32>
    %48 = arith.addf %43, %47 : vector<2x10x1xf32>
    %49 = vector.extract_strided_slice %0 {offsets = [0, 0, 8], sizes = [2, 10, 1], strides = [1, 1, 1]} : vector<2x10x10xf32> to vector<2x10x1xf32>
    %50 = vector.extract_strided_slice %1 {offsets = [0, 8, 0], sizes = [2, 1, 1], strides = [1, 1, 1]} : vector<2x10x1xf32> to vector<2x1x1xf32>
    %51 = vector.broadcast %50 : vector<2x1x1xf32> to vector<2x10x1xf32>
    %52 = arith.mulf %49, %51 : vector<2x10x1xf32>
    %53 = arith.addf %48, %52 : vector<2x10x1xf32>
    %54 = vector.extract_strided_slice %0 {offsets = [0, 0, 9], sizes = [2, 10, 1], strides = [1, 1, 1]} : vector<2x10x10xf32> to vector<2x10x1xf32>
    %55 = vector.extract_strided_slice %1 {offsets = [0, 9, 0], sizes = [2, 1, 1], strides = [1, 1, 1]} : vector<2x10x1xf32> to vector<2x1x1xf32>
    %56 = vector.broadcast %55 : vector<2x1x1xf32> to vector<2x10x1xf32>
    %57 = arith.mulf %54, %56 : vector<2x10x1xf32>
    %58 = arith.addf %53, %57 : vector<2x10x1xf32>
    %59 = vector.shape_cast %2 : vector<1x8xf32> to vector<1x1x8xf32>
    %60 = vector.broadcast %58 : vector<2x10x1xf32> to vector<2x10x8xf32>
    %61 = vector.broadcast %59 : vector<1x1x8xf32> to vector<2x10x8xf32>
    %62 = arith.mulf %60, %61 : vector<2x10x8xf32>
    %63 = vector.shape_cast %3 : vector<1x8xf32> to vector<1x1x8xf32>
    %64 = vector.broadcast %63 : vector<1x1x8xf32> to vector<2x10x8xf32>
    %65 = arith.addf %62, %64 : vector<2x10x8xf32>
    %cst = arith.constant 0.000000e+00 : f32
    %66 = vector.broadcast %cst : f32 to vector<2x10x8xf32>
    %67 = arith.maximumf %65, %66 : vector<2x10x8xf32>
    %68 = vector.extract_strided_slice %67 {offsets = [0, 0, 0], sizes = [2, 10, 1], strides = [1, 1, 1]} : vector<2x10x8xf32> to vector<2x10x1xf32>
    %69 = vector.extract_strided_slice %7 {offsets = [0, 0], sizes = [1, 8], strides = [1, 1]} : vector<8x8xf32> to vector<1x8xf32>
    %70 = vector.shape_cast %69 : vector<1x8xf32> to vector<1x1x8xf32>
    %71 = vector.broadcast %68 : vector<2x10x1xf32> to vector<2x10x8xf32>
    %72 = vector.broadcast %70 : vector<1x1x8xf32> to vector<2x10x8xf32>
    %73 = arith.mulf %71, %72 : vector<2x10x8xf32>
    %74 = vector.extract_strided_slice %67 {offsets = [0, 0, 1], sizes = [2, 10, 1], strides = [1, 1, 1]} : vector<2x10x8xf32> to vector<2x10x1xf32>
    %75 = vector.extract_strided_slice %7 {offsets = [1, 0], sizes = [1, 8], strides = [1, 1]} : vector<8x8xf32> to vector<1x8xf32>
    %76 = vector.shape_cast %75 : vector<1x8xf32> to vector<1x1x8xf32>
    %77 = vector.broadcast %74 : vector<2x10x1xf32> to vector<2x10x8xf32>
    %78 = vector.broadcast %76 : vector<1x1x8xf32> to vector<2x10x8xf32>
    %79 = arith.mulf %77, %78 : vector<2x10x8xf32>
    %80 = arith.addf %73, %79 : vector<2x10x8xf32>
    %81 = vector.extract_strided_slice %67 {offsets = [0, 0, 2], sizes = [2, 10, 1], strides = [1, 1, 1]} : vector<2x10x8xf32> to vector<2x10x1xf32>
    %82 = vector.extract_strided_slice %7 {offsets = [2, 0], sizes = [1, 8], strides = [1, 1]} : vector<8x8xf32> to vector<1x8xf32>
    %83 = vector.shape_cast %82 : vector<1x8xf32> to vector<1x1x8xf32>
    %84 = vector.broadcast %81 : vector<2x10x1xf32> to vector<2x10x8xf32>
    %85 = vector.broadcast %83 : vector<1x1x8xf32> to vector<2x10x8xf32>
    %86 = arith.mulf %84, %85 : vector<2x10x8xf32>
    %87 = arith.addf %80, %86 : vector<2x10x8xf32>
    %88 = vector.extract_strided_slice %67 {offsets = [0, 0, 3], sizes = [2, 10, 1], strides = [1, 1, 1]} : vector<2x10x8xf32> to vector<2x10x1xf32>
    %89 = vector.extract_strided_slice %7 {offsets = [3, 0], sizes = [1, 8], strides = [1, 1]} : vector<8x8xf32> to vector<1x8xf32>
    %90 = vector.shape_cast %89 : vector<1x8xf32> to vector<1x1x8xf32>
    %91 = vector.broadcast %88 : vector<2x10x1xf32> to vector<2x10x8xf32>
    %92 = vector.broadcast %90 : vector<1x1x8xf32> to vector<2x10x8xf32>
    %93 = arith.mulf %91, %92 : vector<2x10x8xf32>
    %94 = arith.addf %87, %93 : vector<2x10x8xf32>
    %95 = vector.extract_strided_slice %67 {offsets = [0, 0, 4], sizes = [2, 10, 1], strides = [1, 1, 1]} : vector<2x10x8xf32> to vector<2x10x1xf32>
    %96 = vector.extract_strided_slice %7 {offsets = [4, 0], sizes = [1, 8], strides = [1, 1]} : vector<8x8xf32> to vector<1x8xf32>
    %97 = vector.shape_cast %96 : vector<1x8xf32> to vector<1x1x8xf32>
    %98 = vector.broadcast %95 : vector<2x10x1xf32> to vector<2x10x8xf32>
    %99 = vector.broadcast %97 : vector<1x1x8xf32> to vector<2x10x8xf32>
    %100 = arith.mulf %98, %99 : vector<2x10x8xf32>
    %101 = arith.addf %94, %100 : vector<2x10x8xf32>
    %102 = vector.extract_strided_slice %67 {offsets = [0, 0, 5], sizes = [2, 10, 1], strides = [1, 1, 1]} : vector<2x10x8xf32> to vector<2x10x1xf32>
    %103 = vector.extract_strided_slice %7 {offsets = [5, 0], sizes = [1, 8], strides = [1, 1]} : vector<8x8xf32> to vector<1x8xf32>
    %104 = vector.shape_cast %103 : vector<1x8xf32> to vector<1x1x8xf32>
    %105 = vector.broadcast %102 : vector<2x10x1xf32> to vector<2x10x8xf32>
    %106 = vector.broadcast %104 : vector<1x1x8xf32> to vector<2x10x8xf32>
    %107 = arith.mulf %105, %106 : vector<2x10x8xf32>
    %108 = arith.addf %101, %107 : vector<2x10x8xf32>
    %109 = vector.extract_strided_slice %67 {offsets = [0, 0, 6], sizes = [2, 10, 1], strides = [1, 1, 1]} : vector<2x10x8xf32> to vector<2x10x1xf32>
    %110 = vector.extract_strided_slice %7 {offsets = [6, 0], sizes = [1, 8], strides = [1, 1]} : vector<8x8xf32> to vector<1x8xf32>
    %111 = vector.shape_cast %110 : vector<1x8xf32> to vector<1x1x8xf32>
    %112 = vector.broadcast %109 : vector<2x10x1xf32> to vector<2x10x8xf32>
    %113 = vector.broadcast %111 : vector<1x1x8xf32> to vector<2x10x8xf32>
    %114 = arith.mulf %112, %113 : vector<2x10x8xf32>
    %115 = arith.addf %108, %114 : vector<2x10x8xf32>
    %116 = vector.extract_strided_slice %67 {offsets = [0, 0, 7], sizes = [2, 10, 1], strides = [1, 1, 1]} : vector<2x10x8xf32> to vector<2x10x1xf32>
    %117 = vector.extract_strided_slice %7 {offsets = [7, 0], sizes = [1, 8], strides = [1, 1]} : vector<8x8xf32> to vector<1x8xf32>
    %118 = vector.shape_cast %117 : vector<1x8xf32> to vector<1x1x8xf32>
    %119 = vector.broadcast %116 : vector<2x10x1xf32> to vector<2x10x8xf32>
    %120 = vector.broadcast %118 : vector<1x1x8xf32> to vector<2x10x8xf32>
    %121 = arith.mulf %119, %120 : vector<2x10x8xf32>
    %122 = arith.addf %115, %121 : vector<2x10x8xf32>
    %123 = vector.extract_strided_slice %0 {offsets = [0, 0, 0], sizes = [2, 10, 1], strides = [1, 1, 1]} : vector<2x10x10xf32> to vector<2x10x1xf32>
    %124 = vector.extract_strided_slice %122 {offsets = [0, 0, 0], sizes = [2, 1, 8], strides = [1, 1, 1]} : vector<2x10x8xf32> to vector<2x1x8xf32>
    %125 = vector.broadcast %123 : vector<2x10x1xf32> to vector<2x10x8xf32>
    %126 = vector.broadcast %124 : vector<2x1x8xf32> to vector<2x10x8xf32>
    %127 = arith.mulf %125, %126 : vector<2x10x8xf32>
    %128 = vector.extract_strided_slice %0 {offsets = [0, 0, 1], sizes = [2, 10, 1], strides = [1, 1, 1]} : vector<2x10x10xf32> to vector<2x10x1xf32>
    %129 = vector.extract_strided_slice %122 {offsets = [0, 1, 0], sizes = [2, 1, 8], strides = [1, 1, 1]} : vector<2x10x8xf32> to vector<2x1x8xf32>
    %130 = vector.broadcast %128 : vector<2x10x1xf32> to vector<2x10x8xf32>
    %131 = vector.broadcast %129 : vector<2x1x8xf32> to vector<2x10x8xf32>
    %132 = arith.mulf %130, %131 : vector<2x10x8xf32>
    %133 = arith.addf %127, %132 : vector<2x10x8xf32>
    %134 = vector.extract_strided_slice %0 {offsets = [0, 0, 2], sizes = [2, 10, 1], strides = [1, 1, 1]} : vector<2x10x10xf32> to vector<2x10x1xf32>
    %135 = vector.extract_strided_slice %122 {offsets = [0, 2, 0], sizes = [2, 1, 8], strides = [1, 1, 1]} : vector<2x10x8xf32> to vector<2x1x8xf32>
    %136 = vector.broadcast %134 : vector<2x10x1xf32> to vector<2x10x8xf32>
    %137 = vector.broadcast %135 : vector<2x1x8xf32> to vector<2x10x8xf32>
    %138 = arith.mulf %136, %137 : vector<2x10x8xf32>
    %139 = arith.addf %133, %138 : vector<2x10x8xf32>
    %140 = vector.extract_strided_slice %0 {offsets = [0, 0, 3], sizes = [2, 10, 1], strides = [1, 1, 1]} : vector<2x10x10xf32> to vector<2x10x1xf32>
    %141 = vector.extract_strided_slice %122 {offsets = [0, 3, 0], sizes = [2, 1, 8], strides = [1, 1, 1]} : vector<2x10x8xf32> to vector<2x1x8xf32>
    %142 = vector.broadcast %140 : vector<2x10x1xf32> to vector<2x10x8xf32>
    %143 = vector.broadcast %141 : vector<2x1x8xf32> to vector<2x10x8xf32>
    %144 = arith.mulf %142, %143 : vector<2x10x8xf32>
    %145 = arith.addf %139, %144 : vector<2x10x8xf32>
    %146 = vector.extract_strided_slice %0 {offsets = [0, 0, 4], sizes = [2, 10, 1], strides = [1, 1, 1]} : vector<2x10x10xf32> to vector<2x10x1xf32>
    %147 = vector.extract_strided_slice %122 {offsets = [0, 4, 0], sizes = [2, 1, 8], strides = [1, 1, 1]} : vector<2x10x8xf32> to vector<2x1x8xf32>
    %148 = vector.broadcast %146 : vector<2x10x1xf32> to vector<2x10x8xf32>
    %149 = vector.broadcast %147 : vector<2x1x8xf32> to vector<2x10x8xf32>
    %150 = arith.mulf %148, %149 : vector<2x10x8xf32>
    %151 = arith.addf %145, %150 : vector<2x10x8xf32>
    %152 = vector.extract_strided_slice %0 {offsets = [0, 0, 5], sizes = [2, 10, 1], strides = [1, 1, 1]} : vector<2x10x10xf32> to vector<2x10x1xf32>
    %153 = vector.extract_strided_slice %122 {offsets = [0, 5, 0], sizes = [2, 1, 8], strides = [1, 1, 1]} : vector<2x10x8xf32> to vector<2x1x8xf32>
    %154 = vector.broadcast %152 : vector<2x10x1xf32> to vector<2x10x8xf32>
    %155 = vector.broadcast %153 : vector<2x1x8xf32> to vector<2x10x8xf32>
    %156 = arith.mulf %154, %155 : vector<2x10x8xf32>
    %157 = arith.addf %151, %156 : vector<2x10x8xf32>
    %158 = vector.extract_strided_slice %0 {offsets = [0, 0, 6], sizes = [2, 10, 1], strides = [1, 1, 1]} : vector<2x10x10xf32> to vector<2x10x1xf32>
    %159 = vector.extract_strided_slice %122 {offsets = [0, 6, 0], sizes = [2, 1, 8], strides = [1, 1, 1]} : vector<2x10x8xf32> to vector<2x1x8xf32>
    %160 = vector.broadcast %158 : vector<2x10x1xf32> to vector<2x10x8xf32>
    %161 = vector.broadcast %159 : vector<2x1x8xf32> to vector<2x10x8xf32>
    %162 = arith.mulf %160, %161 : vector<2x10x8xf32>
    %163 = arith.addf %157, %162 : vector<2x10x8xf32>
    %164 = vector.extract_strided_slice %0 {offsets = [0, 0, 7], sizes = [2, 10, 1], strides = [1, 1, 1]} : vector<2x10x10xf32> to vector<2x10x1xf32>
    %165 = vector.extract_strided_slice %122 {offsets = [0, 7, 0], sizes = [2, 1, 8], strides = [1, 1, 1]} : vector<2x10x8xf32> to vector<2x1x8xf32>
    %166 = vector.broadcast %164 : vector<2x10x1xf32> to vector<2x10x8xf32>
    %167 = vector.broadcast %165 : vector<2x1x8xf32> to vector<2x10x8xf32>
    %168 = arith.mulf %166, %167 : vector<2x10x8xf32>
    %169 = arith.addf %163, %168 : vector<2x10x8xf32>
    %170 = vector.extract_strided_slice %0 {offsets = [0, 0, 8], sizes = [2, 10, 1], strides = [1, 1, 1]} : vector<2x10x10xf32> to vector<2x10x1xf32>
    %171 = vector.extract_strided_slice %122 {offsets = [0, 8, 0], sizes = [2, 1, 8], strides = [1, 1, 1]} : vector<2x10x8xf32> to vector<2x1x8xf32>
    %172 = vector.broadcast %170 : vector<2x10x1xf32> to vector<2x10x8xf32>
    %173 = vector.broadcast %171 : vector<2x1x8xf32> to vector<2x10x8xf32>
    %174 = arith.mulf %172, %173 : vector<2x10x8xf32>
    %175 = arith.addf %169, %174 : vector<2x10x8xf32>
    %176 = vector.extract_strided_slice %0 {offsets = [0, 0, 9], sizes = [2, 10, 1], strides = [1, 1, 1]} : vector<2x10x10xf32> to vector<2x10x1xf32>
    %177 = vector.extract_strided_slice %122 {offsets = [0, 9, 0], sizes = [2, 1, 8], strides = [1, 1, 1]} : vector<2x10x8xf32> to vector<2x1x8xf32>
    %178 = vector.broadcast %176 : vector<2x10x1xf32> to vector<2x10x8xf32>
    %179 = vector.broadcast %177 : vector<2x1x8xf32> to vector<2x10x8xf32>
    %180 = arith.mulf %178, %179 : vector<2x10x8xf32>
    %181 = arith.addf %175, %180 : vector<2x10x8xf32>
    %182 = vector.shape_cast %4 : vector<1x8xf32> to vector<1x1x8xf32>
    %183 = vector.broadcast %182 : vector<1x1x8xf32> to vector<2x10x8xf32>
    %184 = arith.addf %181, %183 : vector<2x10x8xf32>
    %cst_14 = arith.constant 0.000000e+00 : f32
    %185 = vector.broadcast %cst_14 : f32 to vector<2x10x8xf32>
    %186 = arith.maximumf %184, %185 : vector<2x10x8xf32>
    %187 = vector.extract_strided_slice %186 {offsets = [0, 0, 0], sizes = [2, 1, 8], strides = [1, 1, 1]} : vector<2x10x8xf32> to vector<2x1x8xf32>
    %188 = vector.shape_cast %187 : vector<2x1x8xf32> to vector<2x8xf32>
    %189 = vector.extract_strided_slice %8 {offsets = [0, 0], sizes = [8, 16], strides = [1, 1]} : vector<80x16xf32> to vector<8x16xf32>
    %cst_15 = arith.constant dense<0.000000e+00> : vector<2x16xf32>
    %190 = tpu.matmul %188, %189, %cst_15 {dimension_numbers = #tpu.dot_dimension_numbers<[1], [0], [0], [1], [0, 0, 1, 1], [], []>} : vector<2x8xf32>, vector<8x16xf32>, vector<2x16xf32> -> vector<2x16xf32>
    %191 = vector.extract_strided_slice %186 {offsets = [0, 1, 0], sizes = [2, 1, 8], strides = [1, 1, 1]} : vector<2x10x8xf32> to vector<2x1x8xf32>
    %192 = vector.shape_cast %191 : vector<2x1x8xf32> to vector<2x8xf32>
    %193 = vector.extract_strided_slice %8 {offsets = [8, 0], sizes = [8, 16], strides = [1, 1]} : vector<80x16xf32> to vector<8x16xf32>
    %cst_16 = arith.constant dense<0.000000e+00> : vector<2x16xf32>
    %194 = tpu.matmul %192, %193, %cst_16 {dimension_numbers = #tpu.dot_dimension_numbers<[1], [0], [0], [1], [0, 0, 1, 1], [], []>} : vector<2x8xf32>, vector<8x16xf32>, vector<2x16xf32> -> vector<2x16xf32>
    %195 = arith.addf %190, %194 : vector<2x16xf32>
    %196 = vector.extract_strided_slice %186 {offsets = [0, 2, 0], sizes = [2, 1, 8], strides = [1, 1, 1]} : vector<2x10x8xf32> to vector<2x1x8xf32>
    %197 = vector.shape_cast %196 : vector<2x1x8xf32> to vector<2x8xf32>
    %198 = vector.extract_strided_slice %8 {offsets = [16, 0], sizes = [8, 16], strides = [1, 1]} : vector<80x16xf32> to vector<8x16xf32>
    %cst_17 = arith.constant dense<0.000000e+00> : vector<2x16xf32>
    %199 = tpu.matmul %197, %198, %cst_17 {dimension_numbers = #tpu.dot_dimension_numbers<[1], [0], [0], [1], [0, 0, 1, 1], [], []>} : vector<2x8xf32>, vector<8x16xf32>, vector<2x16xf32> -> vector<2x16xf32>
    %200 = arith.addf %195, %199 : vector<2x16xf32>
    %201 = vector.extract_strided_slice %186 {offsets = [0, 3, 0], sizes = [2, 1, 8], strides = [1, 1, 1]} : vector<2x10x8xf32> to vector<2x1x8xf32>
    %202 = vector.shape_cast %201 : vector<2x1x8xf32> to vector<2x8xf32>
    %203 = vector.extract_strided_slice %8 {offsets = [24, 0], sizes = [8, 16], strides = [1, 1]} : vector<80x16xf32> to vector<8x16xf32>
    %cst_18 = arith.constant dense<0.000000e+00> : vector<2x16xf32>
    %204 = tpu.matmul %202, %203, %cst_18 {dimension_numbers = #tpu.dot_dimension_numbers<[1], [0], [0], [1], [0, 0, 1, 1], [], []>} : vector<2x8xf32>, vector<8x16xf32>, vector<2x16xf32> -> vector<2x16xf32>
    %205 = arith.addf %200, %204 : vector<2x16xf32>
    %206 = vector.extract_strided_slice %186 {offsets = [0, 4, 0], sizes = [2, 1, 8], strides = [1, 1, 1]} : vector<2x10x8xf32> to vector<2x1x8xf32>
    %207 = vector.shape_cast %206 : vector<2x1x8xf32> to vector<2x8xf32>
    %208 = vector.extract_strided_slice %8 {offsets = [32, 0], sizes = [8, 16], strides = [1, 1]} : vector<80x16xf32> to vector<8x16xf32>
    %cst_19 = arith.constant dense<0.000000e+00> : vector<2x16xf32>
    %209 = tpu.matmul %207, %208, %cst_19 {dimension_numbers = #tpu.dot_dimension_numbers<[1], [0], [0], [1], [0, 0, 1, 1], [], []>} : vector<2x8xf32>, vector<8x16xf32>, vector<2x16xf32> -> vector<2x16xf32>
    %210 = arith.addf %205, %209 : vector<2x16xf32>
    %211 = vector.extract_strided_slice %186 {offsets = [0, 5, 0], sizes = [2, 1, 8], strides = [1, 1, 1]} : vector<2x10x8xf32> to vector<2x1x8xf32>
    %212 = vector.shape_cast %211 : vector<2x1x8xf32> to vector<2x8xf32>
    %213 = vector.extract_strided_slice %8 {offsets = [40, 0], sizes = [8, 16], strides = [1, 1]} : vector<80x16xf32> to vector<8x16xf32>
    %cst_20 = arith.constant dense<0.000000e+00> : vector<2x16xf32>
    %214 = tpu.matmul %212, %213, %cst_20 {dimension_numbers = #tpu.dot_dimension_numbers<[1], [0], [0], [1], [0, 0, 1, 1], [], []>} : vector<2x8xf32>, vector<8x16xf32>, vector<2x16xf32> -> vector<2x16xf32>
    %215 = arith.addf %210, %214 : vector<2x16xf32>
    %216 = vector.extract_strided_slice %186 {offsets = [0, 6, 0], sizes = [2, 1, 8], strides = [1, 1, 1]} : vector<2x10x8xf32> to vector<2x1x8xf32>
    %217 = vector.shape_cast %216 : vector<2x1x8xf32> to vector<2x8xf32>
    %218 = vector.extract_strided_slice %8 {offsets = [48, 0], sizes = [8, 16], strides = [1, 1]} : vector<80x16xf32> to vector<8x16xf32>
    %cst_21 = arith.constant dense<0.000000e+00> : vector<2x16xf32>
    %219 = tpu.matmul %217, %218, %cst_21 {dimension_numbers = #tpu.dot_dimension_numbers<[1], [0], [0], [1], [0, 0, 1, 1], [], []>} : vector<2x8xf32>, vector<8x16xf32>, vector<2x16xf32> -> vector<2x16xf32>
    %220 = arith.addf %215, %219 : vector<2x16xf32>
    %221 = vector.extract_strided_slice %186 {offsets = [0, 7, 0], sizes = [2, 1, 8], strides = [1, 1, 1]} : vector<2x10x8xf32> to vector<2x1x8xf32>
    %222 = vector.shape_cast %221 : vector<2x1x8xf32> to vector<2x8xf32>
    %223 = vector.extract_strided_slice %8 {offsets = [56, 0], sizes = [8, 16], strides = [1, 1]} : vector<80x16xf32> to vector<8x16xf32>
    %cst_22 = arith.constant dense<0.000000e+00> : vector<2x16xf32>
    %224 = tpu.matmul %222, %223, %cst_22 {dimension_numbers = #tpu.dot_dimension_numbers<[1], [0], [0], [1], [0, 0, 1, 1], [], []>} : vector<2x8xf32>, vector<8x16xf32>, vector<2x16xf32> -> vector<2x16xf32>
    %225 = arith.addf %220, %224 : vector<2x16xf32>
    %226 = vector.extract_strided_slice %186 {offsets = [0, 8, 0], sizes = [2, 1, 8], strides = [1, 1, 1]} : vector<2x10x8xf32> to vector<2x1x8xf32>
    %227 = vector.shape_cast %226 : vector<2x1x8xf32> to vector<2x8xf32>
    %228 = vector.extract_strided_slice %8 {offsets = [64, 0], sizes = [8, 16], strides = [1, 1]} : vector<80x16xf32> to vector<8x16xf32>
    %cst_23 = arith.constant dense<0.000000e+00> : vector<2x16xf32>
    %229 = tpu.matmul %227, %228, %cst_23 {dimension_numbers = #tpu.dot_dimension_numbers<[1], [0], [0], [1], [0, 0, 1, 1], [], []>} : vector<2x8xf32>, vector<8x16xf32>, vector<2x16xf32> -> vector<2x16xf32>
    %230 = arith.addf %225, %229 : vector<2x16xf32>
    %231 = vector.extract_strided_slice %186 {offsets = [0, 9, 0], sizes = [2, 1, 8], strides = [1, 1, 1]} : vector<2x10x8xf32> to vector<2x1x8xf32>
    %232 = vector.shape_cast %231 : vector<2x1x8xf32> to vector<2x8xf32>
    %233 = vector.extract_strided_slice %8 {offsets = [72, 0], sizes = [8, 16], strides = [1, 1]} : vector<80x16xf32> to vector<8x16xf32>
    %cst_24 = arith.constant dense<0.000000e+00> : vector<2x16xf32>
    %234 = tpu.matmul %232, %233, %cst_24 {dimension_numbers = #tpu.dot_dimension_numbers<[1], [0], [0], [1], [0, 0, 1, 1], [], []>} : vector<2x8xf32>, vector<8x16xf32>, vector<2x16xf32> -> vector<2x16xf32>
    %235 = arith.addf %230, %234 : vector<2x16xf32>
    %236 = vector.broadcast %5 : vector<1x16xf32> to vector<2x16xf32>
    %237 = arith.addf %235, %236 : vector<2x16xf32>
    %cst_25 = arith.constant 0.000000e+00 : f32
    %238 = vector.broadcast %cst_25 : f32 to vector<2x16xf32>
    %239 = arith.maximumf %237, %238 : vector<2x16xf32>
    %cst_26 = arith.constant dense<0.000000e+00> : vector<2x128xf32>
    %240 = tpu.matmul %239, %9, %cst_26 {dimension_numbers = #tpu.dot_dimension_numbers<[1], [0], [0], [1], [0, 0, 1, 1], [], []>} : vector<2x16xf32>, vector<16x128xf32>, vector<2x128xf32> -> vector<2x128xf32>
    %241 = vector.broadcast %6 : vector<1x128xf32> to vector<2x128xf32>
    %242 = arith.addf %240, %241 : vector<2x128xf32>
    %c0_27 = arith.constant 0 : index
    %c0_28 = arith.constant 0 : index
    %243 = vector.load %arg4[%c0_27, %c0_28] : memref<2x128xf32, #tpu.memory_space<vmem>>, vector<2x128xf32>
    tpu.vector_store %arg4[%c0_27, %c0_28], %242 {strides = array<i32>} : memref<2x128xf32, #tpu.memory_space<vmem>>, vector<2x128xf32>,
    return
  }
  func.func @transform_0(%arg0: i32) -> (i32, i32, i32) {
    %c0_i32 = arith.constant 0 : i32
    %c0_i32_0 = arith.constant 0 : i32
    %c0_i32_1 = arith.constant 0 : i32
    return %arg0, %c0_i32, %c0_i32_0 : i32, i32, i32
  }
  func.func @transform_1(%arg0: i32) -> (i32, i32, i32) {
    %c0_i32 = arith.constant 0 : i32
    %c0_i32_0 = arith.constant 0 : i32
    %c0_i32_1 = arith.constant 0 : i32
    return %arg0, %c0_i32, %c0_i32_0 : i32, i32, i32
  }
  func.func @transform_2(%arg0: i32) -> (i32, i32) {
    %c0_i32 = arith.constant 0 : i32
    %c0_i32_0 = arith.constant 0 : i32
    %c0_i32_1 = arith.constant 0 : i32
    return %c0_i32, %c0_i32_0 : i32, i32
  }
  func.func @transform_3(%arg0: i32) -> (i32, i32) {
    %c0_i32 = arith.constant 0 : i32
    %c0_i32_0 = arith.constant 0 : i32
    return %arg0, %c0_i32 : i32, i32
  }
}

</mosaic_0001>

<bundles_post_ra>
// kernel: tpu_custom_call.1
= control target key start
LH: loop header
LB: loop body
LE: loop exit
PB: predicated region body
PF: predicated region fallthrough
CT: control target
= control target key end

     0   :  { %8 = vsyncpa [#allocation3], 0  ;;  %s2796_s0 = inlined_call_operand.vmem [shape: f32[2,10,10], index: 0, kind: input, shape index: {}]   ;;  %s2797_s1 = inlined_call_operand.vmem [shape: f32[2,10,1], index: 1, kind: input, shape index: {}]   ;;  %s2798_s2 = inlined_call_operand.hbm [shape: f32[112,128], index: 2, kind: input, shape index: {}]   ;;  %s2799_s3 = inlined_call_operand.hbm [shape: f32[2,128], index: 3, kind: output, shape index: {}]  }
   0x1   :  { %9 = vsyncpa [#allocation4], 0  ;;  %s2117_s12 = smov [#allocation2]  }
   0x2   :  { %s19_s13 = sshll.u32 %s2117_s12, 4  ;;  %s20_s13 = int_to_ptr.vmem [resolvable:$true] %s19_s13 }
   0x3   :  { %s2081_s14 = scalar_lea.vmem %s20_s13, 1792  ;;  %p2086_p1 = scmp.lt.s32.totalorder %s20_s13, %s20_s13 }
   0x4   :  { %p2082_p0 = scmp.ne.s32.totalorder %s20_s13, %s2081_s14  ;;  %p2087_p2 = scmp.lt.s32.totalorder %s2081_s14, %s2081_s14 }
   0x6   :  { %p2088_p3 = por %p2087_p2, %p2086_p1 }
   0x8   :  { %p2089_p4 = pnand %p2088_p3, %p2082_p0 }
   0xa   :  { %2092 = shalt.err (!%p2089_p4)
}
   0xb   :  { %s2118_s15 = smov 128   ;;  %s2119_s16 = smov 8  }
   0xc   :  { %25 = dma.hbm_to_vmem [thread:$0]  %s2798_s2, 1792, %s20_s13, [#allocation3], %s2118_s15, %s2118_s15, %s2119_s16  }
   0xd   :  { %2113 = dma.done.wait [#allocation3], 1792  }
   0xe   :  { %2114 = vsyncadd [#allocation3], 4294965504  ;;  %v55_v0 = vlaneseq  ;;  %v2120_v1 = vmov 0   ;;  %v2121_v3 = vmov 3   ;;  %v2183_v6 = vld [vmem:[%s2797_s1] sm:$0xff]  ;;  %v2188_v7 = vld [vmem:[%s2797_s1 + $0x10] sm:$0xff] }
   0xf   :  { %2012 = vset.pattern.permute.xlu1 %v2120_v1  ;;  %2015 = vset.pattern.permute.xlu0 %v2121_v3  ;;  %s2122_s22 = smov 1   ;;  %s2123_s23 = smov 2   ;;  %v34_v28 = vld [vmem:[%s2797_s1 + $0x8] sm:$0x3]  ;;  %v36_v29 = vld [vmem:[%s2797_s1 + $0x18] sm:$0x3] }
  0x10   :  { %v56_v2 = vshrl.u32 %v55_v0, 7  ;;  %s2124_s24 = smov 3   ;;  %s2125_s25 = smov 4   ;;  %v2245_v34 = vld [vmem:[%s2796_s0] sm:$0xff]  ;;  %v2252_v35 = vld [vmem:[%s2796_s0 + $0x10] sm:$0xff]  ;;  %v2130_v36 = vmov 1  }
  0x11   :  { %s2126_s26 = smov 5   ;;  %s2127_s27 = smov 6   ;;  %v2131_v37 = vmov 2   ;;  %v2132_v38 = vmov 4   ;;  %v2133_v39 = vmov 5   ;;  %vm2148_vm0 = vmmov 0  }
  0x12   :  { %v2176_v4 = vsub.s32 1, %v56_v2  ;;  %v2178_v5 = vsub.s32 2, %v56_v2  ;;  %v2198_v12 = vsub.s32 3, %v56_v2  ;;  %v2204_v15 = vsub.s32 4, %v56_v2  ;;  %s2128_s5 = smov 7   ;;  %s2129_s6 = smov 9  }
  0x13   :  { %v2210_v18 = vsub.s32 5, %v56_v2  ;;  %v2216_v21 = vsub.s32 6, %v56_v2  ;;  %v2222_v24 = vsub.s32 7, %v56_v2  ;;  %v2228_v27 = vsub.s32 0, %v56_v2  ;;  %s2134_s10 = smov 127   ;;  %s2135_s11 = smov 126  }
  0x14   :  { %v70_v8 = vrot.slane %v2183_v6, %v2176_v4  ;;  %v110_v9 = vrot.slane %v2183_v6, %v2178_v5  ;;  %v74_v10 = vrot.slane %v2188_v7, %v2176_v4  ;;  %v114_v11 = vrot.slane %v2188_v7, %v2178_v5  ;;  %s2136_s12 = smov 125   ;;  %s2137_s13 = smov 124  }
  0x15   :  { %v150_v13 = vrot.slane %v2183_v6, %v2198_v12  ;;  %v154_v14 = vrot.slane %v2188_v7, %v2198_v12  ;;  %v190_v16 = vrot.slane %v2183_v6, %v2204_v15  ;;  %v194_v17 = vrot.slane %v2188_v7, %v2204_v15  ;;  %s2138_s14 = smov 123   ;;  %s2139_s15 = smov 122  }
  0x16   :  { %77 = vrot.lane.b32.xlu0 %v70_v8, %s2122_s22  ;;  %117 = vrot.lane.b32.xlu1 %v110_v9, %s2123_s23  ;;  %v230_v19 = vrot.slane %v2183_v6, %v2210_v18  ;;  %v234_v20 = vrot.slane %v2188_v7, %v2210_v18  ;;  %v270_v22 = vrot.slane %v2183_v6, %v2216_v21  ;;  %v2290_v9 = vld [vmem:[%s2796_s0 + $0x8] sm:$0x3]  ;;  %s2140_s18 = smov 121   ;;  %s2141_s2 = smov 120   ;;  %vm1026_vm1 = vcmask 1041409  }
  0x17   :  { %v274_v23 = vrot.slane %v2188_v7, %v2216_v21  ;;  %v310_v25 = vrot.slane %v2183_v6, %v2222_v24  ;;  %v314_v26 = vrot.slane %v2188_v7, %v2222_v24  ;;  %v350_v30 = vrot.slane %v34_v28, %v2228_v27  ;;  %s2149_s21 = smov [#allocation5]  }
  0x18   :  { %v354_v31 = vrot.slane %v36_v29, %v2228_v27  ;;  %v390_v32 = vrot.slane %v34_v28, %v2176_v4  ;;  %v394_v33 = vrot.slane %v36_v29, %v2176_v4  ;;  %vm1028_vm2 = vcmask 64512  }
  0x19   :  { %vm1793_vm3 = vcmask 130048  }
  0x1a   :  { %79 = vrot.lane.b32.xlu0 %v74_v10, %s2122_s22  ;;  %119 = vrot.lane.b32.xlu1 %v114_v11, %s2123_s23  ;;  %s1874_s22 = sshll.u32 %s2149_s21, 4  ;;  %s1875_s22 = int_to_ptr.vmem [resolvable:$true] %s1874_s22 }
  0x1b   :  { %s2093_s23 = scalar_lea.vmem %s1875_s22, 32  ;;  %p2098_p6 = scmp.lt.s32.totalorder %s1875_s22, %s1875_s22 }
  0x1c   :  { %p2094_p5 = scmp.ne.s32.totalorder %s1875_s22, %s2093_s23  ;;  %p2099_p7 = scmp.lt.s32.totalorder %s2093_s23, %s2093_s23 }
  0x1e   :  { %157 = vrot.lane.b32.xlu0 %v150_v13, %s2124_s24  ;;  %159 = vrot.lane.b32.xlu1 %v154_v14, %s2124_s24  ;;  %v2299_v14 = vld [vmem:[%s2796_s0 + $0x18] sm:$0x3]  ;;  %s2142_s0 = smov 119   ;;  %p2100_p8 = por %p2099_p7, %p2098_p6 }
  0x20   :  { %p2101_p9 = pnand %p2100_p8, %p2094_p5 }
  0x22   :  { %197 = vrot.lane.b32.xlu0 %v190_v16, %s2125_s25  ;;  %199 = vrot.lane.b32.xlu1 %v194_v17, %s2125_s25 }
  0x26   :  { %237 = vrot.lane.b32.xlu0 %v230_v19, %s2126_s26  ;;  %239 = vrot.lane.b32.xlu1 %v234_v20, %s2126_s26 }
  0x2a   :  { %277 = vrot.lane.b32.xlu0 %v270_v22, %s2127_s27  ;;  %279 = vrot.lane.b32.xlu1 %v274_v23, %s2127_s27 }
  0x2e   :  { %317 = vrot.lane.b32.xlu0 %v310_v25, %s2128_s5  ;;  %319 = vrot.lane.b32.xlu1 %v314_v26, %s2128_s5 }
  0x32   :  { %357 = vrot.lane.b32.xlu0 %v350_v30, %s2119_s16  ;;  %359 = vrot.lane.b32.xlu1 %v354_v31, %s2119_s16 }
  0x36   :  { %397 = vrot.lane.b32.xlu0 %v390_v32, %s2129_s6  ;;  %399 = vrot.lane.b32.xlu1 %v394_v33, %s2129_s6 }
  0x3a   :  { %693 = vperm.xlu1 %2012, %v2245_v34   ;;  %788 = vperm.xlu0 %2015, %v2245_v34  }
  0x3e   :  { %2013 = vset.pattern.permute.xlu1 %v2130_v36  ;;  %796 = vperm.xlu0 %2015, %v2252_v35  }
  0x3f   :  { %732 = vperm.xlu1 %2013, %v2252_v35  }
  0x42   :  { %2017 = vset.pattern.permute.xlu0 %v2133_v39 }
  0x43   :  { %2014 = vset.pattern.permute.xlu1 %v2131_v37 }
  0x44   :  { %756 = vperm.xlu1 %2014, %v2245_v34  }
  0x48   :  { %764 = vperm.xlu1 %2014, %v2252_v35  }
  0x4c   :  { %2016 = vset.pattern.permute.xlu1 %v2132_v38 }
  0x4d   :  { %820 = vperm.xlu1 %2016, %v2245_v34  }
  0x88   :  { %v78_v40 = vpop.permute.xlu0 %77  ;;  %v118_v41 = vpop.permute.xlu1 %117 }
  0x89   :  { %v83_v42 = vmul.f32 %v78_v40, %v2245_v34  ;;  %v123_v43 = vmul.f32 %v118_v41, %v2245_v34  ;;  %v84_v13 = vmul.f32 %v78_v40, %v2290_v9  ;;  %v124_v23 = vmul.f32 %v118_v41, %v2290_v9 }
  0x8b   :  { %91 = vrot.lane.b32.xlu0 %v83_v42, %s2134_s10 }
  0x8c   :  { %v80_v44 = vpop.permute.xlu0 %79  ;;  %v120_v45 = vpop.permute.xlu1 %119 }
  0x8d   :  { %v85_v46 = vmul.f32 %v80_v44, %v2252_v35  ;;  %v125_v47 = vmul.f32 %v120_v45, %v2252_v35  ;;  %v86_v19 = vmul.f32 %v80_v44, %v2299_v14  ;;  %v126_v28 = vmul.f32 %v120_v45, %v2299_v14 }
  0x8f   :  { %95 = vrot.lane.b32.xlu1 %v85_v46, %s2134_s10  ;;  %131 = vrot.lane.b32.xlu0 %v123_v43, %s2135_s11 }
  0x90   :  { %v158_v48 = vpop.permute.xlu0 %157  ;;  %v160_v49 = vpop.permute.xlu1 %159 }
  0x91   :  { %v163_v50 = vmul.f32 %v158_v48, %v2245_v34  ;;  %v165_v51 = vmul.f32 %v160_v49, %v2252_v35  ;;  %v164_v30 = vmul.f32 %v158_v48, %v2290_v9  ;;  %v166_v31 = vmul.f32 %v160_v49, %v2299_v14 }
  0x93   :  { %135 = vrot.lane.b32.xlu1 %v125_v47, %s2135_s11  ;;  %171 = vrot.lane.b32.xlu0 %v163_v50, %s2136_s12  ;;  %v2143_v50 = vmov 6  }
  0x94   :  { %v198_v52 = vpop.permute.xlu0 %197  ;;  %v200_v53 = vpop.permute.xlu1 %199 }
  0x95   :  { %v203_v54 = vmul.f32 %v198_v52, %v2245_v34  ;;  %v205_v55 = vmul.f32 %v200_v53, %v2252_v35  ;;  %v204_v32 = vmul.f32 %v198_v52, %v2290_v9  ;;  %v206_v33 = vmul.f32 %v200_v53, %v2299_v14 }
  0x96   :  { %v2145_v53 = vmov 8  }
  0x97   :  { %175 = vrot.lane.b32.xlu1 %v165_v51, %s2136_s12  ;;  %211 = vrot.lane.b32.xlu0 %v203_v54, %s2137_s13  ;;  %v2144_v51 = vmov 7   ;;  %v2800_v54 = vmov 9  }
  0x98   :  { %v238_v56 = vpop.permute.xlu0 %237  ;;  %v240_v57 = vpop.permute.xlu1 %239 }
  0x99   :  { %v243_v58 = vmul.f32 %v238_v56, %v2245_v34  ;;  %v245_v59 = vmul.f32 %v240_v57, %v2252_v35  ;;  %v244_v40 = vmul.f32 %v238_v56, %v2290_v9  ;;  %v246_v41 = vmul.f32 %v240_v57, %v2299_v14 }
  0x9b   :  { %215 = vrot.lane.b32.xlu1 %v205_v55, %s2137_s13  ;;  %251 = vrot.lane.b32.xlu0 %v243_v58, %s2138_s14 }
  0x9c   :  { %v278_v60 = vpop.permute.xlu0 %277  ;;  %v280_v61 = vpop.permute.xlu1 %279 }
  0x9d   :  { %v283_v62 = vmul.f32 %v278_v60, %v2245_v34  ;;  %v285_v63 = vmul.f32 %v280_v61, %v2252_v35  ;;  %v284_v42 = vmul.f32 %v278_v60, %v2290_v9  ;;  %v286_v43 = vmul.f32 %v280_v61, %v2299_v14 }
  0x9f   :  { %255 = vrot.lane.b32.xlu1 %v245_v59, %s2138_s14  ;;  %291 = vrot.lane.b32.xlu0 %v283_v62, %s2139_s15 }
  0xa0   :  { %v318_v0 = vpop.permute.xlu0 %317  ;;  %v320_v2 = vpop.permute.xlu1 %319 }
  0xa1   :  { %v323_v8 = vmul.f32 %v318_v0, %v2245_v34  ;;  %v325_v10 = vmul.f32 %v320_v2, %v2252_v35  ;;  %v324_v44 = vmul.f32 %v318_v0, %v2290_v9  ;;  %v326_v45 = vmul.f32 %v320_v2, %v2299_v14 }
  0xa3   :  { %295 = vrot.lane.b32.xlu1 %v285_v63, %s2139_s15  ;;  %331 = vrot.lane.b32.xlu0 %v323_v8, %s2140_s18 }
  0xa4   :  { %v358_v11 = vpop.permute.xlu0 %357  ;;  %v360_v17 = vpop.permute.xlu1 %359 }
  0xa5   :  { %v363_v16 = vmul.f32 %v358_v11, %v2245_v34  ;;  %v365_v20 = vmul.f32 %v360_v17, %v2252_v35  ;;  %v364_v46 = vmul.f32 %v358_v11, %v2290_v9  ;;  %v366_v47 = vmul.f32 %v360_v17, %v2299_v14 }
  0xa7   :  { %93 = vrot.lane.b32.xlu1 %v84_v13, %s2134_s10  ;;  %335 = vrot.lane.b32.xlu0 %v325_v10, %s2140_s18 }
  0xa8   :  { %v398_v22 = vpop.permute.xlu0 %397  ;;  %v400_v26 = vpop.permute.xlu1 %399 }
  0xa9   :  { %v403_v25 = vmul.f32 %v398_v22, %v2245_v34  ;;  %v405_v29 = vmul.f32 %v400_v26, %v2252_v35  ;;  %v404_v48 = vmul.f32 %v398_v22, %v2290_v9  ;;  %v406_v49 = vmul.f32 %v400_v26, %v2299_v14 }
  0xaa   :  { %v62_v22 = vrot.slane %v2188_v7, %v2228_v27 }
  0xab   :  { %371 = vrot.lane.b32.xlu1 %v363_v16, %s2141_s2  ;;  %97 = vrot.lane.b32.xlu0 %v86_v19, %s2134_s10  ;;  %v58_v16 = vrot.slane %v2183_v6, %v2228_v27 }
  0xaf   :  { %133 = vrot.lane.b32.xlu1 %v124_v23, %s2135_s11  ;;  %375 = vrot.lane.b32.xlu0 %v365_v20, %s2141_s2  ;;  %v63_v20 = vmul.f32 %v58_v16, %v2245_v34 }
  0xb3   :  { %411 = vrot.lane.b32.xlu1 %v403_v25, %s2142_s0  ;;  %137 = vrot.lane.b32.xlu0 %v126_v28, %s2135_s11  ;;  %v65_v28 = vmul.f32 %v62_v22, %v2252_v35 }
  0xb5   :  { %v2357_v52 = vpop.permute.xlu1 %693  ;;  %v2373_v57 = vpop.permute.xlu0 %788 }
  0xb7   :  { %173 = vrot.lane.b32.xlu1 %v164_v30, %s2136_s12  ;;  %415 = vrot.lane.b32.xlu0 %v405_v29, %s2142_s0 }
  0xb9   :  { %v2379_v59 = vpop.permute.xlu0 %796 }
  0xba   :  { %v2364_v55 = vpop.permute.xlu1 %732 }
  0xbb   :  { %177 = vrot.lane.b32.xlu1 %v166_v31, %s2136_s12  ;;  %213 = vrot.lane.b32.xlu0 %v204_v32, %s2137_s13 }
  0xbf   :  { %217 = vrot.lane.b32.xlu1 %v206_v33, %s2137_s13  ;;  %253 = vrot.lane.b32.xlu0 %v244_v40, %s2138_s14  ;;  %v2371_v56 = vpop.permute.xlu1 %756 }
  0xc3   :  { %257 = vrot.lane.b32.xlu1 %v246_v41, %s2138_s14  ;;  %293 = vrot.lane.b32.xlu0 %v284_v42, %s2139_s15  ;;  %v2377_v58 = vpop.permute.xlu1 %764 }
  0xc7   :  { %297 = vrot.lane.b32.xlu1 %v286_v43, %s2139_s15  ;;  %333 = vrot.lane.b32.xlu0 %v324_v44, %s2140_s18 }
  0xc8   :  { %v2383_v60 = vpop.permute.xlu1 %820 }
  0xcb   :  { %337 = vrot.lane.b32.xlu1 %v326_v45, %s2140_s18  ;;  %373 = vrot.lane.b32.xlu0 %v364_v46, %s2141_s2 }
  0xcf   :  { %377 = vrot.lane.b32.xlu1 %v366_v47, %s2141_s2  ;;  %413 = vrot.lane.b32.xlu0 %v404_v48, %s2142_s0 }
  0xd3   :  { %417 = vrot.lane.b32.xlu1 %v406_v49, %s2142_s0  ;;  %852 = vperm.xlu0 %2017, %v2245_v34  }
  0xd7   :  { %828 = vperm.xlu1 %2016, %v2252_v35   ;;  %2019 = vset.pattern.permute.xlu0 %v2143_v50 }
  0xd8   :  { %884 = vperm.xlu0 %2019, %v2245_v34  }
  0xdb   :  { %2018 = vset.pattern.permute.xlu1 %v2133_v39 }
  0xdc   :  { %860 = vperm.xlu1 %2018, %v2252_v35   ;;  %2022 = vset.pattern.permute.xlu0 %v2144_v51 }
  0xdd   :  { %924 = vperm.xlu0 %2022, %v2252_v35  }
  0xe0   :  { %2020 = vset.pattern.permute.xlu1 %v2143_v50 }
  0xe1   :  { %892 = vperm.xlu1 %2020, %v2252_v35   ;;  %2023 = vset.pattern.permute.xlu0 %v2130_v36 }
  0xe2   :  { %724 = vperm.xlu0 %2023, %v2245_v34  }
  0xe5   :  { %2021 = vset.pattern.permute.xlu1 %v2144_v51 }
  0xe6   :  { %916 = vperm.xlu1 %2021, %v2245_v34   ;;  %736 = vperm.xlu0 %2023, %v2299_v14  }
  0xea   :  { %2024 = vset.pattern.permute.xlu1 %v2145_v53  ;;  %2030 = vset.pattern.permute.xlu0 %v2800_v54 }
  0xeb   :  { %948 = vperm.xlu1 %2024, %v2245_v34   ;;  %988 = vperm.xlu0 %2030, %v2252_v35  }
  0xef   :  { %2025 = vset.pattern.permute.xlu1 %v2120_v1  ;;  %2032 = vset.pattern.permute.xlu0 %v2120_v1 }
  0xf0   :  { %708 = vperm.xlu1 %2025, %v2299_v14  }
  0xf4   :  { %2026 = vset.pattern.permute.xlu1 %v2145_v53 }
  0xf5   :  { %956 = vperm.xlu1 %2026, %v2252_v35  }
  0xf9   :  { %2027 = vset.pattern.permute.xlu1 %v2800_v54 }
  0xfa   :  { %980 = vperm.xlu1 %2027, %v2245_v34  }
  0xfd   :  { %v92_v61 = vpop.permute.xlu0 %91 }
  0xfe   :  { %2028 = vset.pattern.permute.xlu1 %v2130_v36  ;;  %v103_v26 = vadd.f32 %v92_v61, %v63_v20 }
  0xff   :  { %728 = vperm.xlu1 %2028, %v2290_v9  }
 0x101   :  { %v96_v62 = vpop.permute.xlu1 %95  ;;  %v132_v63 = vpop.permute.xlu0 %131 }
 0x102   :  { %v143_v29 = vadd.f32 %v132_v63, %v103_v26  ;;  %v105_v31 = vadd.f32 %v96_v62, %v65_v28 }
 0x103   :  { %2029 = vset.pattern.permute.xlu1 %v2131_v37 }
 0x104   :  { %768 = vperm.xlu1 %2029, %v2299_v14  }
 0x105   :  { %v136_v0 = vpop.permute.xlu1 %135  ;;  %v172_v2 = vpop.permute.xlu0 %171 }
 0x106   :  { %v183_v32 = vadd.f32 %v172_v2, %v143_v29  ;;  %v145_v33 = vadd.f32 %v136_v0, %v105_v31 }
 0x108   :  { %760 = vperm.xlu1 %2029, %v2290_v9  }
 0x109   :  { %v176_v8 = vpop.permute.xlu1 %175  ;;  %v212_v10 = vpop.permute.xlu0 %211 }
 0x10a   :  { %v223_v40 = vadd.f32 %v212_v10, %v183_v32  ;;  %v185_v42 = vadd.f32 %v176_v8, %v145_v33 }
 0x10c   :  { %2031 = vset.pattern.permute.xlu1 %v2121_v3 }
 0x10d   :  { %v216_v11 = vpop.permute.xlu1 %215  ;;  %v252_v13 = vpop.permute.xlu0 %251  ;;  %800 = vperm.xlu1 %2031, %v2299_v14  }
 0x10e   :  { %v263_v7 = vadd.f32 %v252_v13, %v223_v40  ;;  %v225_v43 = vadd.f32 %v216_v11, %v185_v42  ;;  %v64_v13 = vmul.f32 %v58_v16, %v2290_v9 }
 0x111   :  { %v256_v17 = vpop.permute.xlu1 %255  ;;  %v292_v19 = vpop.permute.xlu0 %291  ;;  %2035 = vset.pattern.permute.xlu1 %v2132_v38 }
 0x112   :  { %832 = vperm.xlu1 %2035, %v2299_v14   ;;  %v303_v44 = vadd.f32 %v292_v19, %v263_v7  ;;  %v265_v47 = vadd.f32 %v256_v17, %v225_v43 }
 0x115   :  { %v296_v23 = vpop.permute.xlu1 %295  ;;  %v332_v25 = vpop.permute.xlu0 %331 }
 0x116   :  { %2036 = vset.pattern.permute.xlu1 %v2120_v1  ;;  %v343_v48 = vadd.f32 %v332_v25, %v303_v44  ;;  %v305_v49 = vadd.f32 %v296_v23, %v265_v47  ;;  %v66_v23 = vmul.f32 %v62_v22, %v2299_v14 }
 0x119   :  { %v94_v6 = vpop.permute.xlu1 %93  ;;  %v336_v30 = vpop.permute.xlu0 %335 }
 0x11a   :  { %v345_v26 = vadd.f32 %v336_v30, %v305_v49 }
 0x11d   :  { %v372_v34 = vpop.permute.xlu1 %371  ;;  %v98_v41 = vpop.permute.xlu0 %97 }
 0x11e   :  { %v383_v61 = vadd.f32 %v372_v34, %v343_v48  ;;  %v106_v30 = vadd.f32 %v98_v41, %v66_v23 }
 0x121   :  { %v134_v45 = vpop.permute.xlu1 %133  ;;  %v376_v46 = vpop.permute.xlu0 %375 }
 0x122   :  { %v385_v62 = vadd.f32 %v376_v46, %v345_v26 }
 0x125   :  { %v412_v20 = vpop.permute.xlu1 %411  ;;  %v138_v63 = vpop.permute.xlu0 %137 }
 0x126   :  { %v423_v54 = vadd.f32 %v412_v20, %v383_v61  ;;  %v146_v31 = vadd.f32 %v138_v63, %v106_v30 }
 0x128   :  { %429 = vperm.xlu0 %2032, %v423_v54   ;;  %v104_v54 = vadd.f32 %v94_v6, %v64_v13 }
 0x129   :  { %v174_v0 = vpop.permute.xlu1 %173  ;;  %v416_v2 = vpop.permute.xlu0 %415 }
 0x12a   :  { %v425_v10 = vadd.f32 %v416_v2, %v385_v62  ;;  %v144_v25 = vadd.f32 %v134_v45, %v104_v54 }
 0x12c   :  { %439 = vperm.xlu1 %2036, %v425_v10   ;;  %2033 = vset.pattern.permute.xlu0 %v2121_v3  ;;  %v184_v16 = vadd.f32 %v174_v0, %v144_v25 }
 0x12d   :  { %v178_v8 = vpop.permute.xlu1 %177  ;;  %v214_v11 = vpop.permute.xlu0 %213  ;;  %792 = vperm.xlu0 %2033, %v2290_v9  }
 0x12e   :  { %v224_v32 = vadd.f32 %v214_v11, %v184_v16  ;;  %v186_v34 = vadd.f32 %v178_v8, %v146_v31 }
 0x130   :  { %2037 = vset.pattern.permute.xlu1 %v2132_v38 }
 0x131   :  { %v218_v17 = vpop.permute.xlu1 %217  ;;  %v254_v19 = vpop.permute.xlu0 %253  ;;  %824 = vperm.xlu1 %2037, %v2290_v9   ;;  %2034 = vset.pattern.permute.xlu0 %v2120_v1 }
 0x132   :  { %703 = vperm.xlu0 %2034, %v2252_v35   ;;  %v264_v42 = vadd.f32 %v254_v19, %v224_v32  ;;  %v226_v6 = vadd.f32 %v218_v17, %v186_v34 }
 0x135   :  { %v258_v28 = vpop.permute.xlu1 %257  ;;  %v294_v29 = vpop.permute.xlu0 %293  ;;  %2038 = vset.pattern.permute.xlu1 %v2120_v1 }
 0x136   :  { %698 = vperm.xlu0 %2034, %v2290_v9   ;;  %v304_v7 = vadd.f32 %v294_v29, %v264_v42  ;;  %v266_v35 = vadd.f32 %v258_v28, %v226_v6 }
 0x139   :  { %v298_v33 = vpop.permute.xlu1 %297  ;;  %v334_v40 = vpop.permute.xlu0 %333 }
 0x13a   :  { %v344_v44 = vadd.f32 %v334_v40, %v304_v7  ;;  %v306_v45 = vadd.f32 %v298_v33, %v266_v35  ;;  %v1883_v33 = vld [vmem:[#allocation2] ss:$0 sm:$0xff]  ;;  %v1884_v40 = vld [vmem:[#allocation2 + $0x1] ss:$0 sm:$0xff] }
 0x13d   :  { %v338_v22 = vpop.permute.xlu1 %337  ;;  %v374_v43 = vpop.permute.xlu0 %373 }
 0x13e   :  { %v384_v46 = vadd.f32 %v374_v43, %v344_v44  ;;  %v346_v41 = vadd.f32 %v338_v22, %v306_v45 }
 0x141   :  { %v378_v47 = vpop.permute.xlu1 %377  ;;  %v414_v48 = vpop.permute.xlu0 %413 }
 0x142   :  { %v424_v49 = vadd.f32 %v414_v48, %v384_v46  ;;  %v386_v61 = vadd.f32 %v378_v47, %v346_v41 }
 0x144   :  { %434 = vperm.xlu1 %2038, %v424_v49  }
 0x145   :  { %v418_v20 = vpop.permute.xlu1 %417 }
 0x146   :  { %v426_v63 = vadd.f32 %v418_v20, %v386_v61 }
 0x148   :  { %444 = vperm.xlu0 %2034, %v426_v63  }
 0x14c   :  { %2039 = vset.pattern.permute.xlu0 %v2130_v36 }
 0x14e   :  { %v2426_v13 = vpop.permute.xlu0 %852 }
 0x152   :  { %v2412_v26 = vpop.permute.xlu1 %828 }
 0x153   :  { %v2430_v19 = vpop.permute.xlu0 %884 }
 0x157   :  { %v2414_v62 = vpop.permute.xlu1 %860 }
 0x158   :  { %v2434_v23 = vpop.permute.xlu0 %924 }
 0x15c   :  { %v2416_v0 = vpop.permute.xlu1 %892 }
 0x15d   :  { %v2438_v28 = vpop.permute.xlu0 %724 }
 0x161   :  { %v2418_v2 = vpop.permute.xlu1 %916  ;;  %v2442_v30 = vpop.permute.xlu0 %736 }
 0x166   :  { %v2420_v10 = vpop.permute.xlu1 %948  ;;  %v2446_v31 = vpop.permute.xlu0 %988 }
 0x167   :  { %2808 = vst [vmem:[#allocation12_spill] sm:$0xff] %v2446_v31 }
 0x16b   :  { %v2422_v8 = vpop.permute.xlu1 %708 }
 0x170   :  { %v2424_v11 = vpop.permute.xlu1 %956 }
 0x171   :  { %2804 = vst [vmem:[#allocation8_spill] sm:$0xff] %v2424_v11 }
 0x175   :  { %v2428_v17 = vpop.permute.xlu1 %980 }
 0x17a   :  { %v2432_v54 = vpop.permute.xlu1 %728 }
 0x17f   :  { %v2436_v25 = vpop.permute.xlu1 %768 }
 0x180   :  { %2805 = vst [vmem:[#allocation9_spill] sm:$0xff] %v2436_v25 }
 0x183   :  { %v2440_v29 = vpop.permute.xlu1 %760 }
 0x184   :  { %2806 = vst [vmem:[#allocation10_spill] sm:$0xff] %v2440_v29 }
 0x188   :  { %v2444_v16 = vpop.permute.xlu1 %800 }
 0x189   :  { %2807 = vst [vmem:[#allocation11_spill] sm:$0xff] %v2444_v16 }
 0x18d   :  { %v2448_v32 = vpop.permute.xlu1 %832 }
 0x18e   :  { %2809 = vst [vmem:[#allocation13_spill] sm:$0xff] %v2448_v32 }
 0x1a3   :  { %v430_v34 = vpop.permute.xlu0 %429 }
 0x1a4   :  { %v451_v42 = vmul.f32 %v1883_v33, %v430_v34 }
 0x1a6   :  { %v459_v6 = vadd.f32 %v1884_v40, %v451_v42 }
 0x1a7   :  { %v440_v7 = vpop.permute.xlu1 %439 }
 0x1a8   :  { %v463_v22 = vmax.f32 %v459_v6, 0.0  ;;  %v453_v43 = vmul.f32 %v1883_v33, %v440_v7  ;;  %v2451_v45 = vpop.permute.xlu0 %792 }
 0x1a9   :  { %2810 = vst [vmem:[#allocation14_spill] sm:$0xff] %v2451_v45 }
 0x1aa   :  { %v461_v35 = vadd.f32 %v1884_v40, %v453_v43  ;;  %496 = vperm.xlu0 %2039, %v463_v22   ;;  %469 = vperm.xlu1 %2038, %v463_v22  }
 0x1ac   :  { %v465_v44 = vmax.f32 %v461_v35, 0.0  ;;  %v2459_v47 = vpop.permute.xlu1 %824 }
 0x1ad   :  { %v2456_v46 = vpop.permute.xlu0 %703  ;;  %2811 = vst [vmem:[#allocation15_spill] sm:$0xff] %v2459_v47 }
 0x1ae   :  { %2041 = vset.pattern.permute.xlu0 %v2131_v37  ;;  %479 = vperm.xlu1 %2038, %v465_v44  }
 0x1af   :  { %524 = vperm.xlu0 %2041, %v463_v22  }
 0x1b1   :  { %v2463_v48 = vpop.permute.xlu0 %698 }
 0x1b2   :  { %2040 = vset.pattern.permute.xlu1 %v2130_v36 }
 0x1b3   :  { %2044 = vset.pattern.permute.xlu0 %v2121_v3  ;;  %504 = vperm.xlu1 %2040, %v465_v44  }
 0x1b4   :  { %560 = vperm.xlu0 %2044, %v465_v44  }
 0x1b7   :  { %2042 = vset.pattern.permute.xlu1 %v2131_v37 }
 0x1b8   :  { %2046 = vset.pattern.permute.xlu0 %v2133_v39  ;;  %532 = vperm.xlu1 %2042, %v465_v44  }
 0x1b9   :  { %608 = vperm.xlu0 %2046, %v463_v22  }
 0x1bc   :  { %2043 = vset.pattern.permute.xlu1 %v2121_v3 }
 0x1bd   :  { %2049 = vset.pattern.permute.xlu0 %v2143_v50  ;;  %552 = vperm.xlu1 %2043, %v463_v22  }
 0x1be   :  { %644 = vperm.xlu0 %2049, %v465_v44  }
 0x1bf   :  { %v435_v41 = vpop.permute.xlu1 %434 }
 0x1c0   :  { %v452_v49 = vmul.f32 %v1883_v33, %v435_v41 }
 0x1c1   :  { %2045 = vset.pattern.permute.xlu1 %v2132_v38 }
 0x1c2   :  { %v460_v61 = vadd.f32 %v1884_v40, %v452_v49  ;;  %580 = vperm.xlu1 %2045, %v463_v22   ;;  %2052 = vset.pattern.permute.xlu0 %v2130_v36  ;;  %v2812_v36 = vmov 9  }
 0x1c3   :  { %v445_v20 = vpop.permute.xlu0 %444 }
 0x1c4   :  { %v464_v63 = vmax.f32 %v460_v61, 0.0  ;;  %v454_v34 = vmul.f32 %v1883_v33, %v445_v20 }
 0x1c6   :  { %v462_v42 = vadd.f32 %v1884_v40, %v454_v34  ;;  %500 = vperm.xlu0 %2052, %v464_v63   ;;  %588 = vperm.xlu1 %2045, %v465_v44  }
 0x1c8   :  { %v466_v6 = vmax.f32 %v462_v42, 0.0 }
 0x1ca   :  { %2047 = vset.pattern.permute.xlu1 %v2133_v39  ;;  %508 = vperm.xlu0 %2052, %v466_v6  }
 0x1cb   :  { %616 = vperm.xlu1 %2047, %v465_v44  }
 0x1ce   :  { %2056 = vset.pattern.permute.xlu0 %v2131_v37 }
 0x1cf   :  { %2048 = vset.pattern.permute.xlu1 %v2143_v50  ;;  %536 = vperm.xlu0 %2056, %v466_v6  }
 0x1d0   :  { %636 = vperm.xlu1 %2048, %v463_v22  }
 0x1d3   :  { %2059 = vset.pattern.permute.xlu0 %v2132_v38 }
 0x1d4   :  { %2050 = vset.pattern.permute.xlu1 %v2144_v51  ;;  %592 = vperm.xlu0 %2059, %v466_v6  }
 0x1d5   :  { %664 = vperm.xlu1 %2050, %v463_v22  }
 0x1d8   :  { %2062 = vset.pattern.permute.xlu0 %v2143_v50 }
 0x1d9   :  { %2051 = vset.pattern.permute.xlu1 %v2120_v1  ;;  %648 = vperm.xlu0 %2062, %v466_v6  }
 0x1da   :  { %474 = vperm.xlu1 %2051, %v464_v63  }
 0x1dd   :  { %2063 = vset.pattern.permute.xlu0 %v2133_v39 }
 0x1de   :  { %2053 = vset.pattern.permute.xlu1 %v2144_v51  ;;  %864 = vperm.xlu0 %2063, %v2299_v14  }
 0x1df   :  { %672 = vperm.xlu1 %2053, %v465_v44   ;;  %v42_v44 = vld [vmem:[#allocation2 + $0x8] sm:$0xff] }
 0x1e0   :  { %v2510_v49 = vrot.slane %v42_v44, %v2228_v27  ;;  %v2516_v61 = vrot.slane %v42_v44, %v2178_v5  ;;  %v2524_v42 = vrot.slane %v42_v44, %v2198_v12  ;;  %v2535_v45 = vrot.slane %v42_v44, %v2210_v18 }
 0x1e2   :  { %2067 = vset.pattern.permute.xlu0 %v2143_v50 }
 0x1e3   :  { %2054 = vset.pattern.permute.xlu1 %v2120_v1  ;;  %888 = vperm.xlu0 %2067, %v2290_v9   ;;  %v44_v1 = vld [vmem:[#allocation2 + $0x18] sm:$0xff] }
 0x1e4   :  { %484 = vperm.xlu1 %2054, %v466_v6  }
 0x1e7   :  { %2069 = vset.pattern.permute.xlu0 %v2145_v53 }
 0x1e8   :  { %2055 = vset.pattern.permute.xlu1 %v2131_v37  ;;  %960 = vperm.xlu0 %2069, %v2299_v14   ;;  %v43_v37 = vld [vmem:[#allocation2 + $0x10] sm:$0xff] }
 0x1e9   :  { %528 = vperm.xlu1 %2055, %v464_v63  }
 0x1ec   :  { %2072 = vset.pattern.permute.xlu0 %v2812_v36 }
 0x1ed   :  { %2057 = vset.pattern.permute.xlu1 %v2121_v3  ;;  %984 = vperm.xlu0 %2072, %v2290_v9   ;;  %v2802_v3 = vmov 0.0  }
 0x1ee   :  { %556 = vperm.xlu1 %2057, %v464_v63   ;;  %1922 = vmatprep.subr.mxu0 %v2802_v3 }
 0x1ef   :  { %1923 = vmatpush3.msra.mxu0 %v44_v1  ;;  %1924 = vmatprep.mubr.msk.f32.mxu0 %vm2148_vm0, %v2802_v3 }
 0x1f0   :  { %1927 = vmatprep.subr.mxu1 %v2802_v3  ;;  %1929 = vmatprep.mubr.msk.f32.mxu1 %vm2148_vm0, %v2802_v3 }
 0x1f1   :  { %1928 = vmatpush3.msra.mxu1 %v43_v37  ;;  %1932 = vmatprep.subr.mxu0 %v2802_v3 }
 0x1f2   :  { %564 = vperm.xlu1 %2057, %v466_v6   ;;  %1937 = vmatprep.subr.mxu1 %v2802_v3 }
 0x1f6   :  { %2058 = vset.pattern.permute.xlu1 %v2132_v38 }
 0x1f7   :  { %584 = vperm.xlu1 %2058, %v464_v63  }
 0x1fb   :  { %2060 = vset.pattern.permute.xlu1 %v2133_v39 }
 0x1fc   :  { %612 = vperm.xlu1 %2060, %v464_v63  }
 0x200   :  { %620 = vperm.xlu1 %2060, %v466_v6  }
 0x204   :  { %2061 = vset.pattern.permute.xlu1 %v2143_v50 }
 0x205   :  { %640 = vperm.xlu1 %2061, %v464_v63  }
 0x209   :  { %2064 = vset.pattern.permute.xlu1 %v2144_v51 }
 0x20a   :  { %668 = vperm.xlu1 %2064, %v464_v63  }
 0x20e   :  { %676 = vperm.xlu1 %2064, %v466_v6   ;;  %v2527_v6 = vrot.slane %v42_v44, %v2204_v15 }
 0x212   :  { %2065 = vset.pattern.permute.xlu1 %v2133_v39 }
 0x213   :  { %856 = vperm.xlu1 %2065, %v2290_v9  }
 0x217   :  { %2066 = vset.pattern.permute.xlu1 %v2143_v50 }
 0x218   :  { %896 = vperm.xlu1 %2066, %v2299_v14  }
 0x21c   :  { %2068 = vset.pattern.permute.xlu1 %v2144_v51 }
 0x21d   :  { %928 = vperm.xlu1 %2068, %v2299_v14  }
 0x221   :  { %920 = vperm.xlu1 %2068, %v2290_v9  }
 0x225   :  { %v470_v38 = vpop.permute.xlu1 %469  ;;  %2070 = vset.pattern.permute.xlu1 %v2145_v53  ;;  %v497_v35 = vpop.permute.xlu0 %496 }
 0x226   :  { %952 = vperm.xlu1 %2070, %v2290_v9   ;;  %v2513_v9 = vrot.slane %v42_v44, %v2176_v4 }
 0x228   :  { %v515_v20 = vmul.f32 %v2513_v9, %v497_v35 }
 0x229   :  { %v480_v39 = vpop.permute.xlu1 %479 }
 0x22a   :  { %2071 = vset.pattern.permute.xlu1 %v2812_v36  ;;  %v525_v53 = vpop.permute.xlu0 %524 }
 0x22b   :  { %992 = vperm.xlu1 %2071, %v2299_v14   ;;  %v491_v14 = vmul.f32 %v2510_v49, %v470_v38  ;;  %v543_v34 = vmul.f32 %v2516_v61, %v525_v53  ;;  %v493_v38 = vmul.f32 %v2510_v49, %v480_v39 }
 0x22d   :  { %v519_v37 = vadd.f32 %v515_v20, %v491_v14 }
 0x22e   :  { %v505_v50 = vpop.permute.xlu1 %504 }
 0x22f   :  { %v517_v36 = vmul.f32 %v2513_v9, %v505_v50  ;;  %v561_v1 = vpop.permute.xlu0 %560  ;;  %v547_v47 = vadd.f32 %v543_v34, %v519_v37  ;;  %v2538_v50 = vrot.slane %v42_v44, %v2216_v21 }
 0x231   :  { %v521_v16 = vadd.f32 %v517_v36, %v493_v38 }
 0x233   :  { %v533_v51 = vpop.permute.xlu1 %532 }
 0x234   :  { %v545_v35 = vmul.f32 %v2516_v61, %v533_v51  ;;  %v609_v29 = vpop.permute.xlu0 %608  ;;  %v573_v51 = vmul.f32 %v2524_v42, %v561_v1 }
 0x236   :  { %v549_v25 = vadd.f32 %v545_v35, %v521_v16 }
 0x238   :  { %v553_v33 = vpop.permute.xlu1 %552  ;;  %v577_v36 = vadd.f32 %v573_v51, %v549_v25 }
 0x239   :  { %v571_v3 = vmul.f32 %v2524_v42, %v553_v33  ;;  %v2541_v33 = vrot.slane %v42_v44, %v2222_v24  ;;  %v645_v38 = vpop.permute.xlu0 %644 }
 0x23a   :  { %v657_v1 = vmul.f32 %v2538_v50, %v645_v38 }
 0x23b   :  { %v575_v31 = vadd.f32 %v571_v3, %v547_v47 }
 0x23d   :  { %v581_v40 = vpop.permute.xlu1 %580 }
 0x23e   :  { %v599_v53 = vmul.f32 %v2527_v6, %v581_v40  ;;  %v627_v40 = vmul.f32 %v2535_v45, %v609_v29 }
 0x240   :  { %v603_v14 = vadd.f32 %v599_v53, %v575_v31 }
 0x241   :  { %v589_v7 = vpop.permute.xlu1 %588 }
 0x242   :  { %v601_v20 = vmul.f32 %v2527_v6, %v589_v7  ;;  %v631_v47 = vadd.f32 %v627_v40, %v603_v14 }
 0x244   :  { %v605_v37 = vadd.f32 %v601_v20, %v577_v36 }
 0x246   :  { %v617_v22 = vpop.permute.xlu1 %616 }
 0x247   :  { %v629_v16 = vmul.f32 %v2535_v45, %v617_v22 }
 0x249   :  { %v633_v35 = vadd.f32 %v629_v16, %v605_v37 }
 0x24b   :  { %v637_v43 = vpop.permute.xlu1 %636  ;;  %v661_v11 = vadd.f32 %v657_v1, %v633_v35 }
 0x24c   :  { %v655_v34 = vmul.f32 %v2538_v50, %v637_v43  ;;  %v501_v43 = vpop.permute.xlu0 %500 }
 0x24e   :  { %v659_v44 = vadd.f32 %v655_v34, %v631_v47 }
 0x250   :  { %v665_v41 = vpop.permute.xlu1 %664 }
 0x251   :  { %v683_v3 = vmul.f32 %v2541_v33, %v665_v41 }
 0x253   :  { %v2549_v53 = vadd.f32 %v683_v3, %v659_v44 }
 0x255   :  { %v2520_v63 = vpop.permute.xlu1 %474  ;;  %v2555_v25 = vrot.slane %v2549_v53, %v2228_v27  ;;  %v2559_v22 = vrot.slane %v2549_v53, %v2176_v4  ;;  %v2577_v34 = vrot.slane %v2549_v53, %v2178_v5  ;;  %v2587_v3 = vrot.slane %v2549_v53, %v2198_v12 }
 0x257   :  { %v719_v51 = vmul.f32 %v2555_v25, %v2357_v52  ;;  %v779_v47 = vmul.f32 %v2577_v34, %v2371_v56  ;;  %v516_v56 = vmul.f32 %v2513_v9, %v501_v43 }
 0x25a   :  { %v673_v32 = vpop.permute.xlu1 %672 }
 0x25b   :  { %v685_v7 = vmul.f32 %v2541_v33, %v673_v32  ;;  %v747_v32 = vmul.f32 %v2559_v22, %v2438_v28 }
 0x25d   :  { %v2561_v41 = vadd.f32 %v685_v7, %v661_v11  ;;  %v509_v11 = vpop.permute.xlu0 %508  ;;  %v751_v16 = vadd.f32 %v747_v32, %v719_v51  ;;  %v811_v51 = vmul.f32 %v2587_v3, %v2373_v57 }
 0x25f   :  { %v485_v39 = vpop.permute.xlu1 %484  ;;  %v2569_v20 = vrot.slane %v2561_v41, %v2228_v27  ;;  %v2573_v40 = vrot.slane %v2561_v41, %v2176_v4  ;;  %v2591_v37 = vrot.slane %v2561_v41, %v2178_v5  ;;  %v783_v35 = vadd.f32 %v779_v47, %v751_v16 }
 0x260   :  { %v494_v38 = vmul.f32 %v2510_v49, %v485_v39  ;;  %v2602_v5 = vrot.slane %v2549_v53, %v2204_v15  ;;  %v2608_v32 = vrot.slane %v2561_v41, %v2198_v12 }
 0x261   :  { %v721_v52 = vmul.f32 %v2569_v20, %v2456_v46  ;;  %v749_v28 = vmul.f32 %v2573_v40, %v2364_v55  ;;  %v518_v46 = vmul.f32 %v2513_v9, %v509_v11  ;;  %v537_v1 = vpop.permute.xlu0 %536  ;;  %v492_v55 = vmul.f32 %v2510_v49, %v2520_v63 }
 0x262   :  { %v781_v39 = vmul.f32 %v2591_v37, %v2377_v58  ;;  %v546_v63 = vmul.f32 %v2516_v61, %v537_v1  ;;  %v815_v43 = vadd.f32 %v811_v51, %v783_v35  ;;  %v2616_v58 = vrot.slane %v2561_v41, %v2204_v15 }
 0x263   :  { %v753_v7 = vadd.f32 %v749_v28, %v721_v52  ;;  %v522_v11 = vadd.f32 %v518_v46, %v494_v38  ;;  %v520_v16 = vadd.f32 %v516_v56, %v492_v55  ;;  %v843_v12 = vmul.f32 %v2602_v5, %v2383_v60 }
 0x264   :  { %v529_v31 = vpop.permute.xlu1 %528  ;;  %v813_v47 = vmul.f32 %v2608_v32, %v2379_v59  ;;  %v2635_v59 = vrot.slane %v2549_v53, %v2216_v21  ;;  %v845_v56 = vmul.f32 %v2616_v58, %v2412_v26  ;;  %v2651_v26 = vrot.slane %v2561_v41, %v2216_v21 }
 0x265   :  { %v544_v49 = vmul.f32 %v2516_v61, %v529_v31  ;;  %v785_v57 = vadd.f32 %v781_v39, %v753_v7  ;;  %v2622_v31 = vrot.slane %v2549_v53, %v2210_v18  ;;  %v593_v61 = vpop.permute.xlu0 %592  ;;  %v550_v35 = vadd.f32 %v546_v63, %v522_v11 }
 0x266   :  { %v602_v60 = vmul.f32 %v2527_v6, %v593_v61  ;;  %v2631_v7 = vrot.slane %v2561_v41, %v2210_v18  ;;  %v720_v61 = vmul.f32 %v2555_v25, %v2463_v48  ;;  %v748_v21 = vmul.f32 %v2559_v22, %v2432_v54 }
 0x267   :  { %v548_v38 = vadd.f32 %v544_v49, %v520_v16  ;;  %v722_v54 = vmul.f32 %v2569_v20, %v2422_v8 }
 0x269   :  { %v557_v29 = vpop.permute.xlu1 %556 }
 0x26a   :  { %v572_v52 = vmul.f32 %v2524_v42, %v557_v29 }
 0x26c   :  { %v576_v46 = vadd.f32 %v572_v52, %v548_v38 }
 0x26d   :  { %v565_v14 = vpop.permute.xlu1 %564 }
 0x26e   :  { %v574_v28 = vmul.f32 %v2524_v42, %v565_v14  ;;  %v847_v42 = vadd.f32 %v843_v12, %v815_v43  ;;  %v817_v14 = vadd.f32 %v813_v47, %v785_v57  ;;  %v907_v43 = vmul.f32 %v2635_v59, %v2430_v19 }
 0x270   :  { %v578_v15 = vadd.f32 %v574_v28, %v550_v35  ;;  %v849_v11 = vadd.f32 %v845_v56, %v817_v14  ;;  %v2667_v35 = vrot.slane %v2561_v41, %v2222_v24  ;;  %v2815_v56 = vld [vmem:[#allocation9_spill] sm:$0xff] }
 0x272   :  { %v585_v36 = vpop.permute.xlu1 %584  ;;  %v606_v18 = vadd.f32 %v602_v60, %v578_v15  ;;  %v941_v14 = vmul.f32 %v2667_v35, %v2434_v23  ;;  %v2814_v60 = vld [vmem:[#allocation10_spill] sm:$0xff] }
 0x273   :  { %v600_v29 = vmul.f32 %v2527_v6, %v585_v36  ;;  %v875_v36 = vmul.f32 %v2622_v31, %v2426_v13  ;;  %v649_v6 = vpop.permute.xlu0 %648  ;;  %v2647_v13 = vrot.slane %v2549_v53, %v2222_v24  ;;  %v780_v23 = vmul.f32 %v2577_v34, %v2814_v60 }
 0x274   :  { %v658_v28 = vmul.f32 %v2538_v50, %v649_v6 }
 0x275   :  { %v604_v51 = vadd.f32 %v600_v29, %v576_v46  ;;  %v879_v63 = vadd.f32 %v875_v36, %v847_v42  ;;  %v939_v38 = vmul.f32 %v2647_v13, %v2418_v2  ;;  %v750_v2 = vmul.f32 %v2573_v40, %v2442_v30 }
 0x276   :  { %v752_v42 = vadd.f32 %v748_v21, %v720_v61  ;;  %v45_v21 = vld [vmem:[#allocation2 + $0x20] sm:$0xff] }
 0x277   :  { %v613_v44 = vpop.permute.xlu1 %612  ;;  %v911_v53 = vadd.f32 %v907_v43, %v879_v63  ;;  %v754_v40 = vadd.f32 %v750_v2, %v722_v54  ;;  %v865_v15 = vpop.permute.xlu0 %864  ;;  %v46_v54 = vld [vmem:[#allocation2 + $0x28] sm:$0xff] }
 0x278   :  { %v628_v1 = vmul.f32 %v2535_v45, %v613_v44 }
 0x279   :  { %v943_v22 = vadd.f32 %v939_v38, %v911_v53 }
 0x27a   :  { %v632_v49 = vadd.f32 %v628_v1, %v604_v51  ;;  %v2813_v1 = vld [vmem:[#allocation8_spill] sm:$0xff] }
 0x27b   :  { %v621_v9 = vpop.permute.xlu1 %620  ;;  %v2816_v51 = vld [vmem:[#allocation12_spill] sm:$0xff] }
 0x27c   :  { %v630_v44 = vmul.f32 %v2535_v45, %v621_v9  ;;  %v877_v45 = vmul.f32 %v2631_v7, %v2414_v62  ;;  %v909_v62 = vmul.f32 %v2651_v26, %v2416_v0 }
 0x27e   :  { %v634_v9 = vadd.f32 %v630_v44, %v606_v18  ;;  %v881_v12 = vadd.f32 %v877_v45, %v849_v11  ;;  %v784_v44 = vadd.f32 %v780_v23, %v752_v42  ;;  %v2817_v18 = vld [vmem:[#allocation14_spill] sm:$0xff]  ;;  %v878_v42 = vmul.f32 %v2631_v7, %v865_v15  ;;  %v48_v15 = vld [vmem:[#allocation2 + $0x38] sm:$0xff] }
 0x27f   :  { %v812_v63 = vmul.f32 %v2587_v3, %v2817_v18 }
 0x280   :  { %v641_v55 = vpop.permute.xlu1 %640  ;;  %v662_v29 = vadd.f32 %v658_v28, %v634_v9  ;;  %v913_v41 = vadd.f32 %v909_v62, %v881_v12  ;;  %v889_v9 = vpop.permute.xlu0 %888  ;;  %v2819_v28 = vld [vmem:[#allocation15_spill] sm:$0xff] }
 0x281   :  { %v656_v39 = vmul.f32 %v2538_v50, %v641_v55  ;;  %v844_v12 = vmul.f32 %v2602_v5, %v2819_v28 }
 0x282   :  { %v945_v36 = vadd.f32 %v941_v14, %v913_v41  ;;  %v908_v14 = vmul.f32 %v2635_v59, %v889_v9 }
 0x283   :  { %v660_v57 = vadd.f32 %v656_v39, %v632_v49 }
 0x284   :  { %v2718_v38 = vpop.permute.xlu0 %960 }
 0x285   :  { %v669_v16 = vpop.permute.xlu1 %668 }
 0x286   :  { %v684_v52 = vmul.f32 %v2541_v33, %v669_v16  ;;  %v2818_v16 = vld [vmem:[#allocation11_spill] sm:$0xff] }
 0x287   :  { %v814_v45 = vmul.f32 %v2608_v32, %v2818_v16  ;;  %v51_v16 = vld [vmem:[#allocation2 + $0x50] sm:$0xff] }
 0x288   :  { %v688_v19 = vadd.f32 %v684_v52, %v660_v57 }
 0x289   :  { %v677_v47 = vpop.permute.xlu1 %676 }
 0x28a   :  { %v2670_v50 = vrot.slane %v688_v19, %v2228_v27  ;;  %v686_v48 = vmul.f32 %v2541_v33, %v677_v47  ;;  %v2674_v25 = vrot.slane %v688_v19, %v2176_v4  ;;  %v2820_v47 = vld [vmem:[#allocation13_spill] sm:$0xff] }
 0x28b   :  { %v846_v32 = vmul.f32 %v2616_v58, %v2820_v47 }
 0x28c   :  { %v971_v0 = vmul.f32 %v2670_v50, %v2420_v10  ;;  %v690_v24 = vadd.f32 %v686_v48, %v662_v29  ;;  %v1003_v8 = vmul.f32 %v2674_v25, %v2428_v17  ;;  %v2692_v10 = vld [vmem:[#allocation2 + $0x2] ss:$0 sm:$0xff] }
 0x28e   :  { %v2685_v33 = vrot.slane %v690_v24, %v2228_v27  ;;  %v2688_v46 = vrot.slane %v690_v24, %v2176_v4  ;;  %v857_v30 = vpop.permute.xlu1 %856  ;;  %v975_v20 = vadd.f32 %v971_v0, %v943_v22  ;;  %v782_v4 = vmul.f32 %v2591_v37, %v2815_v56 }
 0x28f   :  { %v816_v37 = vadd.f32 %v812_v63, %v784_v44  ;;  %v876_v19 = vmul.f32 %v2622_v31, %v857_v30  ;;  %v2821_v24 = vmov 0.0   ;;  %v47_v30 = vld [vmem:[#allocation2 + $0x30] sm:$0xff] }
 0x290   :  { %v973_v55 = vmul.f32 %v2685_v33, %v2813_v1  ;;  %v1007_v27 = vadd.f32 %v1003_v8, %v975_v20  ;;  %v1005_v17 = vmul.f32 %v2688_v46, %v2816_v51  ;;  %v786_v11 = vadd.f32 %v782_v4, %v754_v40  ;;  %v49_v4 = vld [vmem:[#allocation2 + $0x40] sm:$0xff] }
 0x291   :  { %v848_v62 = vadd.f32 %v844_v12, %v816_v37 }
 0x292   :  { %v1015_v39 = vadd.f32 %v2692_v10, %v1007_v27  ;;  %v977_v6 = vadd.f32 %v973_v55, %v945_v36  ;;  %v818_v52 = vadd.f32 %v814_v45, %v786_v11  ;;  %v985_v55 = vpop.permute.xlu0 %984 }
 0x293   :  { %v897_v49 = vpop.permute.xlu1 %896  ;;  %v880_v2 = vadd.f32 %v876_v19, %v848_v62  ;;  %v53_v62 = vld [vmem:[#allocation2 + $0x60] sm:$0xff] }
 0x294   :  { %v2705_v43 = vmax.f32 %v1015_v39, 0.0  ;;  %v1009_v34 = vadd.f32 %v1005_v17, %v977_v6  ;;  %v850_v31 = vadd.f32 %v846_v32, %v818_v52  ;;  %v910_v8 = vmul.f32 %v2651_v26, %v897_v49  ;;  %v50_v49 = vld [vmem:[#allocation2 + $0x48] sm:$0xff] }
 0x295   :  { %v1004_v6 = vmul.f32 %v2674_v25, %v985_v55  ;;  %v974_v25 = vmul.f32 %v2685_v33, %v2718_v38  ;;  %v52_v33 = vld [vmem:[#allocation2 + $0x58] sm:$0xff]  ;;  %v54_v38 = vld [vmem:[#allocation2 + $0x68] sm:$0xff] }
 0x296   :  { %v1017_v57 = vadd.f32 %v2692_v10, %v1009_v34  ;;  %v1025_v53 = vrot.slane %v2705_v43, 1  ;;  %v1175_v22 = vrot.slane %v2705_v43, 2  ;;  %v1251_v1 = vrot.slane %v2705_v43, 3 }
 0x297   :  { %v882_v59 = vadd.f32 %v878_v42, %v850_v31  ;;  %v1327_v23 = vrot.slane %v2705_v43, 4 }
 0x298   :  { %v929_v61 = vpop.permute.xlu1 %928  ;;  %v2713_v3 = vmax.f32 %v1017_v57, 0.0  ;;  %v1555_v57 = vrot.slane %v2705_v43, 7 }
 0x299   :  { %v942_v26 = vmul.f32 %v2667_v35, %v929_v61  ;;  %v914_v36 = vadd.f32 %v910_v8, %v882_v59  ;;  %v1403_v35 = vrot.slane %v2705_v43, 5 }
 0x29a   :  { %v1027_v29 = vsel %vm1026_vm1, %v2713_v3, %v1025_v53  ;;  %v1101_v48 = vrot.slane %v2713_v3, 7  ;;  %v1176_v5 = vrot.slane %v2713_v3, 1  ;;  %v1252_v41 = vrot.slane %v2713_v3, 2 }
 0x29b   :  { %1925 = vmatmul.mubr.msk.f32.vlgmr.msra.gmra.mxu0 %vm1028_vm2, %v1027_v29  ;;  %v1328_v7 = vrot.slane %v2713_v3, 3  ;;  %v1404_v27 = vrot.slane %v2713_v3, 4  ;;  %v1480_v39 = vrot.slane %v2713_v3, 5  ;;  %v946_v11 = vadd.f32 %v942_v26, %v914_v36 }
 0x29c   :  { %v921_v0 = vpop.permute.xlu1 %920  ;;  %v1102_v58 = vsel %vm1026_vm1, %v1101_v48, %v2705_v43  ;;  %1933 = vmatpush3.msra.mxu0 %v45_v21  ;;  %1934 = vmatprep.mubr.msk.f32.mxu0 %vm2148_vm0, %v2821_v24  ;;  %v1177_v40 = vsel %vm1026_vm1, %v1176_v5, %v1175_v22  ;;  %v1253_v60 = vsel %vm1026_vm1, %v1252_v41, %v1251_v1  ;;  %v1556_v34 = vrot.slane %v2713_v3, 6 }
 0x29d   :  { %1930 = vmatmul.mubr.msk.f32.vlgmr.msra.gmra.mxu1 %vm1028_vm2, %v1102_v58  ;;  %1942 = vmatprep.subr.mxu0 %v2821_v24  ;;  %v940_v20 = vmul.f32 %v2647_v13, %v921_v0  ;;  %v912_v13 = vadd.f32 %v908_v14, %v880_v2  ;;  %v1329_v44 = vsel %vm1026_vm1, %v1328_v7, %v1327_v23 }
 0x29e   :  { %1938 = vmatpush3.msra.mxu1 %v46_v54  ;;  %1939 = vmatprep.mubr.msk.f32.mxu1 %vm2148_vm0, %v2821_v24  ;;  %v1405_v63 = vsel %vm1026_vm1, %v1404_v27, %v1403_v35  ;;  %v978_v52 = vadd.f32 %v974_v25, %v946_v11  ;;  %v1557_v19 = vsel %vm1026_vm1, %v1556_v34, %v1555_v57  ;;  %v1896_v27 = vld [vmem:[#allocation2 + $0x3] ss:$0 sm:$0xff] }
 0x29f   :  { %1935 = vmatmul.mubr.msk.f32.vlgmr.msra.gmra.mxu0 %vm1028_vm2, %v1177_v40  ;;  %1947 = vmatprep.subr.mxu1 %v2821_v24  ;;  %v944_v51 = vadd.f32 %v940_v20, %v912_v13 }
 0x2a0   :  { %1943 = vmatpush3.msra.mxu0 %v47_v30  ;;  %1944 = vmatprep.mubr.msk.f32.mxu0 %vm2148_vm0, %v2821_v24 }
 0x2a1   :  { %v953_v56 = vpop.permute.xlu1 %952  ;;  %1940 = vmatmul.mubr.msk.f32.vlgmr.msra.gmra.mxu1 %vm1028_vm2, %v1253_v60  ;;  %1952 = vmatprep.subr.mxu0 %v2821_v24 }
 0x2a2   :  { %v972_v17 = vmul.f32 %v2670_v50, %v953_v56  ;;  %1948 = vmatpush3.msra.mxu1 %v48_v15  ;;  %1949 = vmatprep.mubr.msk.f32.mxu1 %vm2148_vm0, %v2821_v24  ;;  %v1479_v50 = vrot.slane %v2705_v43, 6 }
 0x2a3   :  { %1945 = vmatmul.mubr.msk.f32.vlgmr.msra.gmra.mxu0 %vm1028_vm2, %v1329_v44  ;;  %1957 = vmatprep.subr.mxu1 %v2821_v24 }
 0x2a4   :  { %v976_v18 = vadd.f32 %v972_v17, %v944_v51  ;;  %1953 = vmatpush3.msra.mxu0 %v49_v4  ;;  %1954 = vmatprep.mubr.msk.f32.mxu0 %vm2148_vm0, %v2821_v24  ;;  %v1481_v37 = vsel %vm1026_vm1, %v1480_v39, %v1479_v50  ;;  %v1897_v51 = vld [vmem:[#allocation2 + $0x4] ss:$0 sm:$0xff] }
 0x2a5   :  { %1950 = vmatmul.mubr.msk.f32.vlgmr.msra.gmra.mxu1 %vm1028_vm2, %v1405_v63  ;;  %1962 = vmatprep.subr.mxu0 %v2821_v24 }
 0x2a6   :  { %v1008_v45 = vadd.f32 %v1004_v6, %v976_v18  ;;  %v993_v9 = vpop.permute.xlu1 %992  ;;  %1958 = vmatpush3.msra.mxu1 %v50_v49  ;;  %1959 = vmatprep.mubr.msk.f32.mxu1 %vm2148_vm0, %v2821_v24 }
 0x2a7   :  { %v1006_v28 = vmul.f32 %v2688_v46, %v993_v9  ;;  %1955 = vmatmul.mubr.msk.f32.vlgmr.msra.gmra.mxu0 %vm1028_vm2, %v1481_v37  ;;  %1967 = vmatprep.subr.mxu1 %v2821_v24 }
 0x2a8   :  { %v1016_v12 = vadd.f32 %v2692_v10, %v1008_v45  ;;  %1963 = vmatpush3.msra.mxu0 %v51_v16  ;;  %1964 = vmatprep.mubr.msk.f32.mxu0 %vm2148_vm0, %v2821_v24 }
 0x2a9   :  { %v1010_v61 = vadd.f32 %v1006_v28, %v978_v52  ;;  %1960 = vmatmul.mubr.msk.f32.vlgmr.msra.gmra.mxu1 %vm1028_vm2, %v1557_v19  ;;  %1972 = vmatprep.subr.mxu0 %v2821_v24 }
 0x2aa   :  { %v1020_v43 = vmax.f32 %v1016_v12, 0.0  ;;  %1968 = vmatpush3.msra.mxu1 %v52_v33  ;;  %1969 = vmatprep.mubr.msk.f32.mxu1 %vm2148_vm0, %v2821_v24 }
 0x2ab   :  { %v1018_v46 = vadd.f32 %v2692_v10, %v1010_v61 }
 0x2ac   :  { %v1708_v3 = vrot.slane %v1020_v43, 1 }
 0x2ad   :  { %v1022_v53 = vmax.f32 %v1018_v46, 0.0 }
 0x2af   :  { %v1633_v47 = vrot.slane %v1022_v53, 7  ;;  %v1709_v32 = vsel %vm1026_vm1, %v1022_v53, %v1708_v3 }
 0x2b0   :  { %1970 = vmatmul.mubr.msk.f32.vlgmr.msra.gmra.mxu1 %vm1028_vm2, %v1709_v32 }
 0x2b1   :  { %v1634_v21 = vsel %vm1026_vm1, %v1633_v47, %v1020_v43 }
 0x2b2   :  { %1965 = vmatmul.mubr.msk.f32.vlgmr.msra.gmra.mxu0 %vm1028_vm2, %v1634_v21 }
 0x2b3   :  { %1976 = vmatprep.mubr.msk.f32.mxu0 %vm2148_vm0, %v2821_v24  ;;  %1973 = vmatpush3.msra.mxu0 %v54_v38 }
 0x2b4   :  { %1974 = vmatprep.subr.mxu0 %v2821_v24 }
 0x2b5   :  { %1975 = vmatpush3.msra.mxu0 %v53_v62 }
 0x35b   :  { %v1097_v10 = vpop.f32.mrf.mxu0 }
 0x35d   :  { %v1926_v29 = vpop.f32.mrf.mxu0  ;;  %v1171_v48 = vpop.f32.mrf.mxu1 }
 0x35e   :  { %v1172_v5 = vadd.f32 %v1171_v48, %v1097_v10 }
 0x35f   :  { %v1931_v31 = vpop.f32.mrf.mxu1  ;;  %v1246_v54 = vpop.f32.mrf.mxu0 }
 0x360   :  { %v1250_v2 = vadd.f32 %v1246_v54, %v1172_v5 }
 0x361   :  { %v1936_v0 = vpop.f32.mrf.mxu0  ;;  %v1322_v58 = vpop.f32.mrf.mxu1 }
 0x362   :  { %v1326_v22 = vadd.f32 %v1322_v58, %v1250_v2 }
 0x363   :  { %v1941_v41 = vpop.f32.mrf.mxu1  ;;  %v1398_v42 = vpop.f32.mrf.mxu0 }
 0x364   :  { %v1402_v14 = vadd.f32 %v1398_v42, %v1326_v22 }
 0x365   :  { %v1946_v8 = vpop.f32.mrf.mxu0  ;;  %v1474_v30 = vpop.f32.mrf.mxu1 }
 0x366   :  { %v1478_v1 = vadd.f32 %v1474_v30, %v1402_v14 }
 0x367   :  { %v1951_v20 = vpop.f32.mrf.mxu1  ;;  %v1550_v40 = vpop.f32.mrf.mxu0 }
 0x368   :  { %v1554_v26 = vadd.f32 %v1550_v40, %v1478_v1 }
 0x369   :  { %v1956_v24 = vpop.f32.mrf.mxu0  ;;  %v1626_v7 = vpop.f32.mrf.mxu1 }
 0x36a   :  { %v1630_v55 = vadd.f32 %v1626_v7, %v1554_v26 }
 0x36b   :  { %v1961_v59 = vpop.f32.mrf.mxu1 }
 0x370   :  { %v1778_v15 = vpop.f32.mrf.mxu1 }
 0x372   :  { %v1703_v13 = vpop.f32.mrf.mxu0  ;;  %v1971_v60 = vpop.f32.mrf.mxu1 }
 0x373   :  { %v1707_v23 = vadd.f32 %v1703_v13, %v1630_v55 }
 0x374   :  { %v1966_v36 = vpop.f32.mrf.mxu0 }
 0x375   :  { %v1782_v56 = vadd.f32 %v1778_v15, %v1707_v23 }
 0x377   :  { %v1787_v35 = vadd.f32 %v1896_v27, %v1782_v56 }
 0x379   :  { %v1788_v4 = vmax.f32 %v1787_v35, 0.0 }
 0x37b   :  { %1977 = vmatmul.mubr.msk.f32.vlgmr.msra.gmra.mxu0 %vm1793_vm3, %v1788_v4 }
 0x43b   :  { %v1863_v17 = vpop.f32.mrf.mxu0 }
 0x43c   :  { %v1864_v44 = vadd.f32 %v1897_v51, %v1863_v17 }
 0x43d   :  { %v1978_v39 = vpop.f32.mrf.mxu0 }
 0x43e   :  { %1867 = vst [vmem:[#allocation5] sm:$0x3] %v1864_v44 }
 0x43f   :  { %2104 = shalt.err (!%p2101_p9)
}
 0x440   :  { %1877 = dma.vmem_to_hbm [thread:$0]  %s1875_s22, 32, %s2799_s3, [#allocation4]  }
 0x441   :  { %2115 = dma.done.wait [#allocation4], 32  }
 0x442   :  { %2116 = vsyncadd [#allocation4], 4294967264 }
 0x443   :  { %1881 = vsyncpa [#allocation3], 1 }
 0x444   :  { %1882 = vsyncpa [#allocation4], 1 }

</bundles_post_ra>
